<compile_context>
chip_gen: v5e
topology: v5e:2x2
jax: 0.10.0
libtpu: 0.0.40
codegen_flags: <defaults>
</compile_context>

<pallas_src>
import functools

import jax
import jax.numpy as jnp
from jax import lax
from jax.experimental import pallas as pl
from jax.experimental.pallas import tpu as pltpu


# ------------------------------ Pallas kernel -------------------------------

def _fused_basic_block_kernel(xp_ref, xid_ref, w1_ref, w2_ref, b1_ref, b2_ref,
                              mask_ref, o_ref, *, shifts, off0, pad1, mp, l1):
    """out = relu( conv2(relu(conv1(x)+b1)*mask) + b2 + identity ).

    Layout (channel-major, pixels on the lane axis):
      xp_ref  : (CP, L0) bf16  spatially padded, flattened, flat-halo'd input
      xid_ref : (CP, Mp) f32   central (padded-grid) pixels for the residual
      w*_ref  : (9, CP, CP) bf16  per-tap conv weights, BN scale pre-folded
      b*_ref  : (CP, 1) f32    folded BatchNorm shift
      mask_ref: (1, L1) f32    1.0 at valid (non-padding) pixel positions
      o_ref   : (CP, Mp) f32   central (padded-grid) pixels, cropped on host
    """
    # ---- conv1 (+ folded bn1 scale): 9 per-tap accumulating MXU dots ----
    s = shifts[0]
    acc1 = jnp.dot(w1_ref[0], xp_ref[:, off0 + s: off0 + s + l1],
                   preferred_element_type=jnp.float32)            # (CP, L1)
    for t in range(1, 9):
        s = shifts[t]
        acc1 = acc1 + jnp.dot(w1_ref[t], xp_ref[:, off0 + s: off0 + s + l1],
                              preferred_element_type=jnp.float32)

    # bn1 shift + relu, then zero every padding position so conv2 sees proper
    # zero-padding semantics; cast once to bf16 for the second conv.
    h1 = (jnp.maximum(acc1 + b1_ref[...], 0.0) * mask_ref[...]).astype(jnp.bfloat16)

    # ---- conv2 (+ folded bn2 scale) over the central Mp pixel positions ----
    s = shifts[0]
    acc2 = jnp.dot(w2_ref[0], h1[:, pad1 + s: pad1 + s + mp],
                   preferred_element_type=jnp.float32)            # (CP, Mp)
    for t in range(1, 9):
        s = shifts[t]
        acc2 = acc2 + jnp.dot(w2_ref[t], h1[:, pad1 + s: pad1 + s + mp],
                              preferred_element_type=jnp.float32)

    # bn2 shift + f32 residual add + relu
    o_ref[...] = jnp.maximum(acc2 + b2_ref[...] + xid_ref[...], 0.0)


# ------------------------------- JAX wrapper ---------------------------------

def _basic_block_forward_impl(x_nchw, w1t, w2t, b1, b2, *, cout, cp):
    n, c, h, w = x_nchw.shape
    hp, wp = h + 2, w + 2                          # spatially padded extents
    m_true = n * hp * wp                           # real flattened padded pixels
    mp = ((m_true + 127) // 128) * 128             # lane-dense (128-aligned) frame
    halo = ((wp + 2 + 63) // 64) * 64              # flat halo (>= wp+1, 64-aligned)
    pad1, off0 = halo, halo
    l1 = mp + 2 * pad1                             # conv1-output frame width
    l0 = mp + 2 * (pad1 + off0)                    # input frame width
    del l0
    shifts = tuple((di - 1) * wp + (dj - 1) for di in range(3) for dj in range(3))

    # --- input: NCHW -> channel-major, spatially padded, flattened
    x32 = x_nchw.astype(jnp.float32)
    xc = jnp.transpose(x32, (1, 0, 2, 3))                          # (C, N, H, W)
    xc = jnp.pad(xc, ((0, cp - c), (0, 0), (1, 1), (1, 1)))        # (CP, N, Hp, Wp)
    x_flat = xc.reshape(cp, m_true)
    x_id = jnp.pad(x_flat, ((0, 0), (0, mp - m_true)))             # (CP, Mp) f32
    xp_bf = jnp.pad(x_flat.astype(jnp.bfloat16),
                    ((0, 0), (pad1 + off0, pad1 + off0 + mp - m_true)))  # (CP, L0)

    # --- validity mask over the L1 frame (constant-folds under jit)
    mask = jnp.pad(jnp.ones((n, h, w), jnp.float32), ((0, 0), (1, 1), (1, 1)))
    mask = jnp.pad(mask.reshape(1, m_true), ((0, 0), (pad1, pad1 + mp - m_true)))

    kernel = functools.partial(_fused_basic_block_kernel, shifts=shifts,
                               off0=off0, pad1=pad1, mp=mp, l1=l1)

    vmem = pl.BlockSpec(memory_space=pltpu.MemorySpace.VMEM)
    out_flat = pl.pallas_call(
        kernel,
        out_shape=jax.ShapeDtypeStruct((cp, mp), jnp.float32),
        in_specs=[vmem] * 7,
        out_specs=vmem,
    )(xp_bf, x_id, w1t, w2t, b1, b2, mask)

    # crop padded channels, lane padding and spatial padding; back to NCHW
    out = out_flat[:cout, :m_true].reshape(cout, n, hp, wp)[:, :, 1:h + 1, 1:w + 1]
    return jnp.transpose(out, (1, 0, 2, 3))


def make_basic_block_forward(params, eps=1e-5):
    """One-time weight/BN preprocessing + a jitted forward(x) closure."""
    cout, cin = params["w1"].shape[:2]
    assert cout == cin, "stride=1 & downsample=None requires in == out channels"
    cp = max(8, ((cout + 7) // 8) * 8)             # channels padded to sublanes

    def fold(g, beta, mean, var):
        sc = g / jnp.sqrt(var + eps)
        return sc, beta - mean * sc

    s1, b1 = fold(params["bn1_gamma"], params["bn1_beta"],
                  params["bn1_mean"], params["bn1_var"])
    s2, b2 = fold(params["bn2_gamma"], params["bn2_beta"],
                  params["bn2_mean"], params["bn2_var"])

    def w_taps(w_oihw, scale):
        # OIHW -> (tap, Cout, Cin) with tap = kh*3+kw, BN scale folded into rows.
        co, ci = w_oihw.shape[:2]
        wsc = w_oihw.astype(jnp.float32) * scale[:, None, None, None]
        wt = jnp.transpose(wsc, (2, 3, 0, 1)).reshape(9, co, ci)
        full = jnp.zeros((9, cp, cp), jnp.float32).at[:, :co, :ci].set(wt)
        return full.astype(jnp.bfloat16)

    def bias(bvec):
        return jnp.zeros((cp, 1), jnp.float32).at[:cout, 0].set(bvec)

    w1t = w_taps(params["w1"], s1)
    w2t = w_taps(params["w2"], s2)
    b1p, b2p = bias(b1), bias(b2)

    @jax.jit
    def forward(x_nchw):
        return _basic_block_forward_impl(x_nchw, w1t, w2t, b1p, b2p,
                                         cout=cout, cp=cp)

    return forward


# -------------------------------- Reference ----------------------------------

def _reference_forward(x_nchw, params, eps=1e-5):
    """Plain-JAX NCHW reference mirroring the PyTorch module (eval-mode BN)."""
    def conv3x3(x, w):
        return lax.conv_general_dilated(
            x, w, window_strides=(1, 1), padding=((1, 1), (1, 1)),
            dimension_numbers=("NCHW", "OIHW", "NCHW"))

    def bn(x, g, b, m, v):
        g = g.reshape(1, -1, 1, 1); b = b.reshape(1, -1, 1, 1)
        m = m.reshape(1, -1, 1, 1); v = v.reshape(1, -1, 1, 1)
        return g * (x - m) / jnp.sqrt(v + eps) + b

    out = jax.nn.relu(bn(conv3x3(x_nchw, params["w1"]),
                         params["bn1_gamma"], params["bn1_beta"],
                         params["bn1_mean"], params["bn1_var"]))
    out = bn(conv3x3(out, params["w2"]),
             params["bn2_gamma"], params["bn2_beta"],
             params["bn2_mean"], params["bn2_var"])
    return jax.nn.relu(out + x_nchw)


# ----------------------------------- Main -------------------------------------

if __name__ == "__main__":
    key = jax.random.PRNGKey(0)
    N, Cin, H, W = 2, 4, 16, 16
    Cout = Cin  # stride=1, downsample=None => in_channels == out_channels

    keys = jax.random.split(key, 9)
    params = {
        "w1": jax.random.normal(keys[0], (Cout, Cin, 3, 3), jnp.float32) * 0.1,
        "w2": jax.random.normal(keys[1], (Cout, Cout, 3, 3), jnp.float32) * 0.1,
        "bn1_gamma": 1.0 + 0.1 * jax.random.normal(keys[2], (Cout,), jnp.float32),
        "bn1_beta": 0.1 * jax.random.normal(keys[3], (Cout,), jnp.float32),
        "bn1_mean": 0.05 * jax.random.normal(keys[4], (Cout,), jnp.float32),
        "bn1_var": jnp.abs(jax.random.normal(keys[5], (Cout,), jnp.float32)) + 0.5,
        "bn2_gamma": 1.0 + 0.1 * jax.random.normal(keys[6], (Cout,), jnp.float32),
        "bn2_beta": 0.1 * jax.random.normal(keys[7], (Cout,), jnp.float32),
        "bn2_mean": jnp.zeros((Cout,), jnp.float32),
        "bn2_var": jnp.ones((Cout,), jnp.float32),
    }

    x = jax.random.normal(keys[8], (N, Cin, H, W), jnp.float32)

    forward = make_basic_block_forward(params)          # one-time weight prep
    out = jax.block_until_ready(forward(x))
    ref = jax.block_until_ready(_reference_forward(x, params))

    assert out.shape == (N, Cout, H, W), out.shape
    # bf16 MXU operands (f32 accumulation, f32 residual/bias) vs pure-f32 ref.
    err = float(jnp.max(jnp.abs(out - ref)))
    assert err < 5e-2, err

    print("KERNEL_OK")
</pallas_src>

<mosaic_0001>
module attributes {stable_mosaic.version = 11 : i64} {
  func.func @_fused_basic_block_kernel(%arg0: memref<8x1024xbf16, #tpu.memory_space<vmem>>, %arg1: memref<8x768xf32, #tpu.memory_space<vmem>>, %arg2: memref<9x8x8xbf16, #tpu.memory_space<vmem>>, %arg3: memref<9x8x8xbf16, #tpu.memory_space<vmem>>, %arg4: memref<8x1xf32, #tpu.memory_space<vmem>>, %arg5: memref<8x1xf32, #tpu.memory_space<vmem>>, %arg6: memref<1x896xf32, #tpu.memory_space<vmem>>, %arg7: memref<8x768xf32, #tpu.memory_space<vmem>>) attributes {dimension_semantics = [], scalar_prefetch = 0 : i64, scratch_operands = 0 : i64, tpu.core_type = #tpu.core_type<tc>} {
    %c0 = arith.constant 0 : index
    %c0_0 = arith.constant 0 : index
    %c0_1 = arith.constant 0 : index
    %0 = vector.load %arg2[%c0, %c0_0, %c0_1] : memref<9x8x8xbf16, #tpu.memory_space<vmem>>, vector<1x8x8xbf16>
    %1 = vector.shape_cast %0 : vector<1x8x8xbf16> to vector<8x8xbf16>
    %c0_2 = arith.constant 0 : index
    %c45 = arith.constant 45 : index
    %2 = vector.load %arg0[%c0_2, %c45] : memref<8x1024xbf16, #tpu.memory_space<vmem>>, vector<8x896xbf16>
    %cst = arith.constant dense<0.000000e+00> : vector<8x896xf32>
    %3 = tpu.matmul %1, %2, %cst {dimension_numbers = #tpu.dot_dimension_numbers<[1], [0], [0], [1], [0, 0, 1, 1], [], []>} : vector<8x8xbf16>, vector<8x896xbf16>, vector<8x896xf32> -> vector<8x896xf32>
    %c1 = arith.constant 1 : index
    %c0_3 = arith.constant 0 : index
    %c0_4 = arith.constant 0 : index
    %4 = vector.load %arg2[%c1, %c0_3, %c0_4] : memref<9x8x8xbf16, #tpu.memory_space<vmem>>, vector<1x8x8xbf16>
    %5 = vector.shape_cast %4 : vector<1x8x8xbf16> to vector<8x8xbf16>
    %c0_5 = arith.constant 0 : index
    %c46 = arith.constant 46 : index
    %6 = vector.load %arg0[%c0_5, %c46] : memref<8x1024xbf16, #tpu.memory_space<vmem>>, vector<8x896xbf16>
    %cst_6 = arith.constant dense<0.000000e+00> : vector<8x896xf32>
    %7 = tpu.matmul %5, %6, %cst_6 {dimension_numbers = #tpu.dot_dimension_numbers<[1], [0], [0], [1], [0, 0, 1, 1], [], []>} : vector<8x8xbf16>, vector<8x896xbf16>, vector<8x896xf32> -> vector<8x896xf32>
    %8 = arith.addf %3, %7 : vector<8x896xf32>
    %c2 = arith.constant 2 : index
    %c0_7 = arith.constant 0 : index
    %c0_8 = arith.constant 0 : index
    %9 = vector.load %arg2[%c2, %c0_7, %c0_8] : memref<9x8x8xbf16, #tpu.memory_space<vmem>>, vector<1x8x8xbf16>
    %10 = vector.shape_cast %9 : vector<1x8x8xbf16> to vector<8x8xbf16>
    %c0_9 = arith.constant 0 : index
    %c47 = arith.constant 47 : index
    %11 = vector.load %arg0[%c0_9, %c47] : memref<8x1024xbf16, #tpu.memory_space<vmem>>, vector<8x896xbf16>
    %cst_10 = arith.constant dense<0.000000e+00> : vector<8x896xf32>
    %12 = tpu.matmul %10, %11, %cst_10 {dimension_numbers = #tpu.dot_dimension_numbers<[1], [0], [0], [1], [0, 0, 1, 1], [], []>} : vector<8x8xbf16>, vector<8x896xbf16>, vector<8x896xf32> -> vector<8x896xf32>
    %13 = arith.addf %8, %12 : vector<8x896xf32>
    %c3 = arith.constant 3 : index
    %c0_11 = arith.constant 0 : index
    %c0_12 = arith.constant 0 : index
    %14 = vector.load %arg2[%c3, %c0_11, %c0_12] : memref<9x8x8xbf16, #tpu.memory_space<vmem>>, vector<1x8x8xbf16>
    %15 = vector.shape_cast %14 : vector<1x8x8xbf16> to vector<8x8xbf16>
    %c0_13 = arith.constant 0 : index
    %c63 = arith.constant 63 : index
    %16 = vector.load %arg0[%c0_13, %c63] : memref<8x1024xbf16, #tpu.memory_space<vmem>>, vector<8x896xbf16>
    %cst_14 = arith.constant dense<0.000000e+00> : vector<8x896xf32>
    %17 = tpu.matmul %15, %16, %cst_14 {dimension_numbers = #tpu.dot_dimension_numbers<[1], [0], [0], [1], [0, 0, 1, 1], [], []>} : vector<8x8xbf16>, vector<8x896xbf16>, vector<8x896xf32> -> vector<8x896xf32>
    %18 = arith.addf %13, %17 : vector<8x896xf32>
    %c4 = arith.constant 4 : index
    %c0_15 = arith.constant 0 : index
    %c0_16 = arith.constant 0 : index
    %19 = vector.load %arg2[%c4, %c0_15, %c0_16] : memref<9x8x8xbf16, #tpu.memory_space<vmem>>, vector<1x8x8xbf16>
    %20 = vector.shape_cast %19 : vector<1x8x8xbf16> to vector<8x8xbf16>
    %c0_17 = arith.constant 0 : index
    %c64 = arith.constant 64 : index
    %21 = vector.load %arg0[%c0_17, %c64] : memref<8x1024xbf16, #tpu.memory_space<vmem>>, vector<8x896xbf16>
    %cst_18 = arith.constant dense<0.000000e+00> : vector<8x896xf32>
    %22 = tpu.matmul %20, %21, %cst_18 {dimension_numbers = #tpu.dot_dimension_numbers<[1], [0], [0], [1], [0, 0, 1, 1], [], []>} : vector<8x8xbf16>, vector<8x896xbf16>, vector<8x896xf32> -> vector<8x896xf32>
    %23 = arith.addf %18, %22 : vector<8x896xf32>
    %c5 = arith.constant 5 : index
    %c0_19 = arith.constant 0 : index
    %c0_20 = arith.constant 0 : index
    %24 = vector.load %arg2[%c5, %c0_19, %c0_20] : memref<9x8x8xbf16, #tpu.memory_space<vmem>>, vector<1x8x8xbf16>
    %25 = vector.shape_cast %24 : vector<1x8x8xbf16> to vector<8x8xbf16>
    %c0_21 = arith.constant 0 : index
    %c65 = arith.constant 65 : index
    %26 = vector.load %arg0[%c0_21, %c65] : memref<8x1024xbf16, #tpu.memory_space<vmem>>, vector<8x896xbf16>
    %cst_22 = arith.constant dense<0.000000e+00> : vector<8x896xf32>
    %27 = tpu.matmul %25, %26, %cst_22 {dimension_numbers = #tpu.dot_dimension_numbers<[1], [0], [0], [1], [0, 0, 1, 1], [], []>} : vector<8x8xbf16>, vector<8x896xbf16>, vector<8x896xf32> -> vector<8x896xf32>
    %28 = arith.addf %23, %27 : vector<8x896xf32>
    %c6 = arith.constant 6 : index
    %c0_23 = arith.constant 0 : index
    %c0_24 = arith.constant 0 : index
    %29 = vector.load %arg2[%c6, %c0_23, %c0_24] : memref<9x8x8xbf16, #tpu.memory_space<vmem>>, vector<1x8x8xbf16>
    %30 = vector.shape_cast %29 : vector<1x8x8xbf16> to vector<8x8xbf16>
    %c0_25 = arith.constant 0 : index
    %c81 = arith.constant 81 : index
    %31 = vector.load %arg0[%c0_25, %c81] : memref<8x1024xbf16, #tpu.memory_space<vmem>>, vector<8x896xbf16>
    %cst_26 = arith.constant dense<0.000000e+00> : vector<8x896xf32>
    %32 = tpu.matmul %30, %31, %cst_26 {dimension_numbers = #tpu.dot_dimension_numbers<[1], [0], [0], [1], [0, 0, 1, 1], [], []>} : vector<8x8xbf16>, vector<8x896xbf16>, vector<8x896xf32> -> vector<8x896xf32>
    %33 = arith.addf %28, %32 : vector<8x896xf32>
    %c7 = arith.constant 7 : index
    %c0_27 = arith.constant 0 : index
    %c0_28 = arith.constant 0 : index
    %34 = vector.load %arg2[%c7, %c0_27, %c0_28] : memref<9x8x8xbf16, #tpu.memory_space<vmem>>, vector<1x8x8xbf16>
    %35 = vector.shape_cast %34 : vector<1x8x8xbf16> to vector<8x8xbf16>
    %c0_29 = arith.constant 0 : index
    %c82 = arith.constant 82 : index
    %36 = vector.load %arg0[%c0_29, %c82] : memref<8x1024xbf16, #tpu.memory_space<vmem>>, vector<8x896xbf16>
    %cst_30 = arith.constant dense<0.000000e+00> : vector<8x896xf32>
    %37 = tpu.matmul %35, %36, %cst_30 {dimension_numbers = #tpu.dot_dimension_numbers<[1], [0], [0], [1], [0, 0, 1, 1], [], []>} : vector<8x8xbf16>, vector<8x896xbf16>, vector<8x896xf32> -> vector<8x896xf32>
    %38 = arith.addf %33, %37 : vector<8x896xf32>
    %c8 = arith.constant 8 : index
    %c0_31 = arith.constant 0 : index
    %c0_32 = arith.constant 0 : index
    %39 = vector.load %arg2[%c8, %c0_31, %c0_32] : memref<9x8x8xbf16, #tpu.memory_space<vmem>>, vector<1x8x8xbf16>
    %40 = vector.shape_cast %39 : vector<1x8x8xbf16> to vector<8x8xbf16>
    %c0_33 = arith.constant 0 : index
    %c83 = arith.constant 83 : index
    %41 = vector.load %arg0[%c0_33, %c83] : memref<8x1024xbf16, #tpu.memory_space<vmem>>, vector<8x896xbf16>
    %cst_34 = arith.constant dense<0.000000e+00> : vector<8x896xf32>
    %42 = tpu.matmul %40, %41, %cst_34 {dimension_numbers = #tpu.dot_dimension_numbers<[1], [0], [0], [1], [0, 0, 1, 1], [], []>} : vector<8x8xbf16>, vector<8x896xbf16>, vector<8x896xf32> -> vector<8x896xf32>
    %43 = arith.addf %38, %42 : vector<8x896xf32>
    %c0_35 = arith.constant 0 : index
    %c0_36 = arith.constant 0 : index
    %44 = vector.load %arg4[%c0_35, %c0_36] : memref<8x1xf32, #tpu.memory_space<vmem>>, vector<8x1xf32>
    %45 = vector.broadcast %44 : vector<8x1xf32> to vector<8x896xf32>
    %46 = arith.addf %43, %45 : vector<8x896xf32>
    %cst_37 = arith.constant 0.000000e+00 : f32
    %47 = vector.broadcast %cst_37 : f32 to vector<8x896xf32>
    %48 = arith.maximumf %46, %47 : vector<8x896xf32>
    %c0_38 = arith.constant 0 : index
    %c0_39 = arith.constant 0 : index
    %49 = vector.load %arg6[%c0_38, %c0_39] : memref<1x896xf32, #tpu.memory_space<vmem>>, vector<1x896xf32>
    %50 = vector.broadcast %49 : vector<1x896xf32> to vector<8x896xf32>
    %51 = arith.mulf %48, %50 : vector<8x896xf32>
    %52 = arith.truncf %51 : vector<8x896xf32> to vector<8x896xbf16>
    %c0_40 = arith.constant 0 : index
    %c0_41 = arith.constant 0 : index
    %c0_42 = arith.constant 0 : index
    %53 = vector.load %arg3[%c0_40, %c0_41, %c0_42] : memref<9x8x8xbf16, #tpu.memory_space<vmem>>, vector<1x8x8xbf16>
    %54 = vector.shape_cast %53 : vector<1x8x8xbf16> to vector<8x8xbf16>
    %55 = vector.extract_strided_slice %52 {offsets = [0, 45], sizes = [8, 768], strides = [1, 1]} : vector<8x896xbf16> to vector<8x768xbf16>
    %cst_43 = arith.constant dense<0.000000e+00> : vector<8x768xf32>
    %56 = tpu.matmul %54, %55, %cst_43 {dimension_numbers = #tpu.dot_dimension_numbers<[1], [0], [0], [1], [0, 0, 1, 1], [], []>} : vector<8x8xbf16>, vector<8x768xbf16>, vector<8x768xf32> -> vector<8x768xf32>
    %c1_44 = arith.constant 1 : index
    %c0_45 = arith.constant 0 : index
    %c0_46 = arith.constant 0 : index
    %57 = vector.load %arg3[%c1_44, %c0_45, %c0_46] : memref<9x8x8xbf16, #tpu.memory_space<vmem>>, vector<1x8x8xbf16>
    %58 = vector.shape_cast %57 : vector<1x8x8xbf16> to vector<8x8xbf16>
    %59 = vector.extract_strided_slice %52 {offsets = [0, 46], sizes = [8, 768], strides = [1, 1]} : vector<8x896xbf16> to vector<8x768xbf16>
    %cst_47 = arith.constant dense<0.000000e+00> : vector<8x768xf32>
    %60 = tpu.matmul %58, %59, %cst_47 {dimension_numbers = #tpu.dot_dimension_numbers<[1], [0], [0], [1], [0, 0, 1, 1], [], []>} : vector<8x8xbf16>, vector<8x768xbf16>, vector<8x768xf32> -> vector<8x768xf32>
    %61 = arith.addf %56, %60 : vector<8x768xf32>
    %c2_48 = arith.constant 2 : index
    %c0_49 = arith.constant 0 : index
    %c0_50 = arith.constant 0 : index
    %62 = vector.load %arg3[%c2_48, %c0_49, %c0_50] : memref<9x8x8xbf16, #tpu.memory_space<vmem>>, vector<1x8x8xbf16>
    %63 = vector.shape_cast %62 : vector<1x8x8xbf16> to vector<8x8xbf16>
    %64 = vector.extract_strided_slice %52 {offsets = [0, 47], sizes = [8, 768], strides = [1, 1]} : vector<8x896xbf16> to vector<8x768xbf16>
    %cst_51 = arith.constant dense<0.000000e+00> : vector<8x768xf32>
    %65 = tpu.matmul %63, %64, %cst_51 {dimension_numbers = #tpu.dot_dimension_numbers<[1], [0], [0], [1], [0, 0, 1, 1], [], []>} : vector<8x8xbf16>, vector<8x768xbf16>, vector<8x768xf32> -> vector<8x768xf32>
    %66 = arith.addf %61, %65 : vector<8x768xf32>
    %c3_52 = arith.constant 3 : index
    %c0_53 = arith.constant 0 : index
    %c0_54 = arith.constant 0 : index
    %67 = vector.load %arg3[%c3_52, %c0_53, %c0_54] : memref<9x8x8xbf16, #tpu.memory_space<vmem>>, vector<1x8x8xbf16>
    %68 = vector.shape_cast %67 : vector<1x8x8xbf16> to vector<8x8xbf16>
    %69 = vector.extract_strided_slice %52 {offsets = [0, 63], sizes = [8, 768], strides = [1, 1]} : vector<8x896xbf16> to vector<8x768xbf16>
    %cst_55 = arith.constant dense<0.000000e+00> : vector<8x768xf32>
    %70 = tpu.matmul %68, %69, %cst_55 {dimension_numbers = #tpu.dot_dimension_numbers<[1], [0], [0], [1], [0, 0, 1, 1], [], []>} : vector<8x8xbf16>, vector<8x768xbf16>, vector<8x768xf32> -> vector<8x768xf32>
    %71 = arith.addf %66, %70 : vector<8x768xf32>
    %c4_56 = arith.constant 4 : index
    %c0_57 = arith.constant 0 : index
    %c0_58 = arith.constant 0 : index
    %72 = vector.load %arg3[%c4_56, %c0_57, %c0_58] : memref<9x8x8xbf16, #tpu.memory_space<vmem>>, vector<1x8x8xbf16>
    %73 = vector.shape_cast %72 : vector<1x8x8xbf16> to vector<8x8xbf16>
    %74 = vector.extract_strided_slice %52 {offsets = [0, 64], sizes = [8, 768], strides = [1, 1]} : vector<8x896xbf16> to vector<8x768xbf16>
    %cst_59 = arith.constant dense<0.000000e+00> : vector<8x768xf32>
    %75 = tpu.matmul %73, %74, %cst_59 {dimension_numbers = #tpu.dot_dimension_numbers<[1], [0], [0], [1], [0, 0, 1, 1], [], []>} : vector<8x8xbf16>, vector<8x768xbf16>, vector<8x768xf32> -> vector<8x768xf32>
    %76 = arith.addf %71, %75 : vector<8x768xf32>
    %c5_60 = arith.constant 5 : index
    %c0_61 = arith.constant 0 : index
    %c0_62 = arith.constant 0 : index
    %77 = vector.load %arg3[%c5_60, %c0_61, %c0_62] : memref<9x8x8xbf16, #tpu.memory_space<vmem>>, vector<1x8x8xbf16>
    %78 = vector.shape_cast %77 : vector<1x8x8xbf16> to vector<8x8xbf16>
    %79 = vector.extract_strided_slice %52 {offsets = [0, 65], sizes = [8, 768], strides = [1, 1]} : vector<8x896xbf16> to vector<8x768xbf16>
    %cst_63 = arith.constant dense<0.000000e+00> : vector<8x768xf32>
    %80 = tpu.matmul %78, %79, %cst_63 {dimension_numbers = #tpu.dot_dimension_numbers<[1], [0], [0], [1], [0, 0, 1, 1], [], []>} : vector<8x8xbf16>, vector<8x768xbf16>, vector<8x768xf32> -> vector<8x768xf32>
    %81 = arith.addf %76, %80 : vector<8x768xf32>
    %c6_64 = arith.constant 6 : index
    %c0_65 = arith.constant 0 : index
    %c0_66 = arith.constant 0 : index
    %82 = vector.load %arg3[%c6_64, %c0_65, %c0_66] : memref<9x8x8xbf16, #tpu.memory_space<vmem>>, vector<1x8x8xbf16>
    %83 = vector.shape_cast %82 : vector<1x8x8xbf16> to vector<8x8xbf16>
    %84 = vector.extract_strided_slice %52 {offsets = [0, 81], sizes = [8, 768], strides = [1, 1]} : vector<8x896xbf16> to vector<8x768xbf16>
    %cst_67 = arith.constant dense<0.000000e+00> : vector<8x768xf32>
    %85 = tpu.matmul %83, %84, %cst_67 {dimension_numbers = #tpu.dot_dimension_numbers<[1], [0], [0], [1], [0, 0, 1, 1], [], []>} : vector<8x8xbf16>, vector<8x768xbf16>, vector<8x768xf32> -> vector<8x768xf32>
    %86 = arith.addf %81, %85 : vector<8x768xf32>
    %c7_68 = arith.constant 7 : index
    %c0_69 = arith.constant 0 : index
    %c0_70 = arith.constant 0 : index
    %87 = vector.load %arg3[%c7_68, %c0_69, %c0_70] : memref<9x8x8xbf16, #tpu.memory_space<vmem>>, vector<1x8x8xbf16>
    %88 = vector.shape_cast %87 : vector<1x8x8xbf16> to vector<8x8xbf16>
    %89 = vector.extract_strided_slice %52 {offsets = [0, 82], sizes = [8, 768], strides = [1, 1]} : vector<8x896xbf16> to vector<8x768xbf16>
    %cst_71 = arith.constant dense<0.000000e+00> : vector<8x768xf32>
    %90 = tpu.matmul %88, %89, %cst_71 {dimension_numbers = #tpu.dot_dimension_numbers<[1], [0], [0], [1], [0, 0, 1, 1], [], []>} : vector<8x8xbf16>, vector<8x768xbf16>, vector<8x768xf32> -> vector<8x768xf32>
    %91 = arith.addf %86, %90 : vector<8x768xf32>
    %c8_72 = arith.constant 8 : index
    %c0_73 = arith.constant 0 : index
    %c0_74 = arith.constant 0 : index
    %92 = vector.load %arg3[%c8_72, %c0_73, %c0_74] : memref<9x8x8xbf16, #tpu.memory_space<vmem>>, vector<1x8x8xbf16>
    %93 = vector.shape_cast %92 : vector<1x8x8xbf16> to vector<8x8xbf16>
    %94 = vector.extract_strided_slice %52 {offsets = [0, 83], sizes = [8, 768], strides = [1, 1]} : vector<8x896xbf16> to vector<8x768xbf16>
    %cst_75 = arith.constant dense<0.000000e+00> : vector<8x768xf32>
    %95 = tpu.matmul %93, %94, %cst_75 {dimension_numbers = #tpu.dot_dimension_numbers<[1], [0], [0], [1], [0, 0, 1, 1], [], []>} : vector<8x8xbf16>, vector<8x768xbf16>, vector<8x768xf32> -> vector<8x768xf32>
    %96 = arith.addf %91, %95 : vector<8x768xf32>
    %c0_76 = arith.constant 0 : index
    %c0_77 = arith.constant 0 : index
    %97 = vector.load %arg5[%c0_76, %c0_77] : memref<8x1xf32, #tpu.memory_space<vmem>>, vector<8x1xf32>
    %98 = vector.broadcast %97 : vector<8x1xf32> to vector<8x768xf32>
    %99 = arith.addf %96, %98 : vector<8x768xf32>
    %c0_78 = arith.constant 0 : index
    %c0_79 = arith.constant 0 : index
    %100 = vector.load %arg1[%c0_78, %c0_79] : memref<8x768xf32, #tpu.memory_space<vmem>>, vector<8x768xf32>
    %101 = arith.addf %99, %100 : vector<8x768xf32>
    %cst_80 = arith.constant 0.000000e+00 : f32
    %102 = vector.broadcast %cst_80 : f32 to vector<8x768xf32>
    %103 = arith.maximumf %101, %102 : vector<8x768xf32>
    %c0_81 = arith.constant 0 : index
    %c0_82 = arith.constant 0 : index
    %104 = vector.load %arg7[%c0_81, %c0_82] : memref<8x768xf32, #tpu.memory_space<vmem>>, vector<8x768xf32>
    tpu.vector_store %arg7[%c0_81, %c0_82], %103 {strides = array<i32>} : memref<8x768xf32, #tpu.memory_space<vmem>>, vector<8x768xf32>,
    return
  }
}

</mosaic_0001>

<bundles_post_ra>
// kernel: forward.1
= control target key start
LH: loop header
LB: loop body
LE: loop exit
PB: predicated region body
PF: predicated region fallthrough
CT: control target
= control target key end

     0   :  { %s2750_s30 = smov 82   ;;  %s2752_s10 = smov 81   ;;  %vm70_vm0 = vcmask 670720   ;;  %vm82_vm1 = vcmask 1043456   ;;  %vm78_vm2 = vcmask 64512   ;;  %vm211_vm3 = vcmask 678912   ;;  %s3652_s0 = inlined_call_operand.vmem [shape: bf16[8,1024], index: 0, kind: input, shape index: {}]   ;;  %s3653_s2 = inlined_call_operand.vmem [shape: bf16[9,8,8], index: 2, kind: input, shape index: {}]   ;;  %s3654_s4 = inlined_call_operand.vmem [shape: f32[8,1], index: 4, kind: input, shape index: {}]   ;;  %s3655_s6 = inlined_call_operand.vmem [shape: f32[1,896], index: 6, kind: input, shape index: {}]   ;;  %s3656_s3 = inlined_call_operand.vmem [shape: bf16[9,8,8], index: 3, kind: input, shape index: {}]   ;;  %s3657_s5 = inlined_call_operand.vmem [shape: f32[8,1], index: 5, kind: input, shape index: {}]   ;;  %s3658_s1 = inlined_call_operand.vmem [shape: f32[8,768], index: 1, kind: input, shape index: {}]   ;;  %s3659_s7 = inlined_call_operand.vmem [shape: f32[8,768], index: 7, kind: output, shape index: {}]  }
   0x1   :  { %v29_v0 = vld [vmem:[%s3652_s0 + $0x8] sm:$0xff]  ;;  %v28_v1 = vld [vmem:[%s3652_s0] sm:$0xff]  ;;  %v30_v4 = vld [vmem:[%s3652_s0 + $0x10] sm:$0xff]  ;;  %s2753_s11 = smov 65   ;;  %s2754_s12 = smov 64   ;;  %vm352_vm4 = vcmask 662528  }
   0x2   :  { %v40_v2 = vunpack.c.l.b16 %v29_v0  ;;  %v38_v3 = vunpack.c.l.b16 %v28_v1  ;;  %v42_v5 = vunpack.c.l.b16 %v30_v4  ;;  %v41_v9 = vunpack.c.h.b16 %v29_v0  ;;  %v31_v14 = vld [vmem:[%s3652_s0 + $0x18] sm:$0xff]  ;;  %s2751_s0 = smov 83   ;;  %s2755_s13 = smov 63   ;;  %v2605_v37 = vld [vmem:[%s3653_s2 + $0x4] sm:$0xf] }
   0x3   :  { %v39_v10 = vunpack.c.h.b16 %v28_v1  ;;  %v43_v11 = vunpack.c.h.b16 %v30_v4  ;;  %v44_v16 = vunpack.c.l.b16 %v31_v14  ;;  %v45_v17 = vunpack.c.h.b16 %v31_v14  ;;  %s2756_s16 = smov 47   ;;  %v2966_v53 = vld [vmem:[%s3653_s2] sm:$0xf]  ;;  %s2757_s19 = smov 46  }
   0x4   :  { %v2809_v6 = vpack.c.b16 %v40_v2, %v40_v2  ;;  %v2811_v7 = vpack.c.b16 %v38_v3, %v38_v3  ;;  %v2813_v8 = vpack.c.b16 %v42_v5, %v42_v5  ;;  %v2821_v12 = vpack.c.b16 %v41_v9, %v41_v9  ;;  %s2758_s20 = smov 45  }
   0x5   :  { %v2823_v13 = vpack.c.b16 %v39_v10, %v39_v10  ;;  %v2828_v15 = vpack.c.b16 %v43_v11, %v43_v11  ;;  %v2836_v18 = vpack.c.b16 %v44_v16, %v44_v16  ;;  %v2838_v19 = vpack.c.b16 %v45_v17, %v45_v17 }
   0x6   :  { %58 = vrot.lane.b32.xlu1 %v2809_v6, %s2750_s30  ;;  %54 = vrot.lane.b32.xlu0 %v2811_v7, %s2750_s30  ;;  %vm500_vm5 = vcmask 531456   ;;  %vm648_vm6 = vcmask 523264   ;;  %vm796_vm7 = vcmask 515072   ;;  %vm944_vm8 = vcmask 384000  }
   0x7   :  { %62 = vrot.lane.b32.xlu2 %v2813_v8, %s2750_s30  ;;  %vm1092_vm9 = vcmask 375808   ;;  %vm1240_vm10 = vcmask 367616  }
   0xe   :  { %60 = vrot.lane.b32.xlu1 %v2821_v12, %s2750_s30  ;;  %56 = vrot.lane.b32.xlu0 %v2823_v13, %s2750_s30 }
   0xf   :  { %64 = vrot.lane.b32.xlu2 %v2828_v15, %s2750_s30 }
  0x16   :  { %66 = vrot.lane.b32.xlu0 %v2836_v18, %s2750_s30  ;;  %68 = vrot.lane.b32.xlu1 %v2838_v19, %s2750_s30 }
  0x17   :  { %195 = vrot.lane.b32.xlu2 %v2811_v7, %s2751_s0 }
  0x1e   :  { %197 = vrot.lane.b32.xlu0 %v2823_v13, %s2751_s0  ;;  %199 = vrot.lane.b32.xlu1 %v2809_v6, %s2751_s0 }
  0x1f   :  { %201 = vrot.lane.b32.xlu2 %v2821_v12, %s2751_s0 }
  0x26   :  { %205 = vrot.lane.b32.xlu1 %v2828_v15, %s2751_s0  ;;  %203 = vrot.lane.b32.xlu0 %v2813_v8, %s2751_s0 }
  0x27   :  { %207 = vrot.lane.b32.xlu2 %v2836_v18, %s2751_s0 }
  0x2e   :  { %209 = vrot.lane.b32.xlu0 %v2838_v19, %s2751_s0  ;;  %336 = vrot.lane.b32.xlu1 %v2811_v7, %s2752_s10 }
  0x2f   :  { %338 = vrot.lane.b32.xlu2 %v2823_v13, %s2752_s10 }
  0x36   :  { %340 = vrot.lane.b32.xlu0 %v2809_v6, %s2752_s10  ;;  %342 = vrot.lane.b32.xlu1 %v2821_v12, %s2752_s10 }
  0x37   :  { %344 = vrot.lane.b32.xlu2 %v2813_v8, %s2752_s10 }
  0x3e   :  { %348 = vrot.lane.b32.xlu1 %v2836_v18, %s2752_s10  ;;  %346 = vrot.lane.b32.xlu0 %v2828_v15, %s2752_s10 }
  0x3f   :  { %350 = vrot.lane.b32.xlu2 %v2838_v19, %s2752_s10 }
  0x46   :  { %484 = vrot.lane.b32.xlu0 %v2811_v7, %s2753_s11  ;;  %486 = vrot.lane.b32.xlu1 %v2823_v13, %s2753_s11 }
  0x47   :  { %488 = vrot.lane.b32.xlu2 %v2809_v6, %s2753_s11 }
  0x4e   :  { %490 = vrot.lane.b32.xlu0 %v2821_v12, %s2753_s11  ;;  %492 = vrot.lane.b32.xlu1 %v2813_v8, %s2753_s11 }
  0x4f   :  { %494 = vrot.lane.b32.xlu2 %v2828_v15, %s2753_s11 }
  0x56   :  { %498 = vrot.lane.b32.xlu1 %v2838_v19, %s2753_s11  ;;  %496 = vrot.lane.b32.xlu0 %v2836_v18, %s2753_s11 }
  0x57   :  { %632 = vrot.lane.b32.xlu2 %v2811_v7, %s2754_s12 }
  0x5e   :  { %634 = vrot.lane.b32.xlu0 %v2823_v13, %s2754_s12  ;;  %636 = vrot.lane.b32.xlu1 %v2809_v6, %s2754_s12 }
  0x5f   :  { %638 = vrot.lane.b32.xlu2 %v2821_v12, %s2754_s12 }
  0x61   :  { %v63_v20 = vpop.permute.xlu2 %62 }
  0x66   :  { %640 = vrot.lane.b32.xlu0 %v2813_v8, %s2754_s12  ;;  %642 = vrot.lane.b32.xlu1 %v2828_v15, %s2754_s12 }
  0x67   :  { %644 = vrot.lane.b32.xlu2 %v2836_v18, %s2754_s12 }
  0x69   :  { %v65_v23 = vpop.permute.xlu2 %64 }
  0x6a   :  { %v75_v24 = vsel %vm70_vm0, %v63_v20, %v65_v23 }
  0x6b   :  { %v96_v27 = vsel %vm82_vm1, %v75_v24, 0 }
  0x6e   :  { %646 = vrot.lane.b32.xlu0 %v2838_v19, %s2754_s12  ;;  %780 = vrot.lane.b32.xlu1 %v2811_v7, %s2755_s13 }
  0x6f   :  { %782 = vrot.lane.b32.xlu2 %v2823_v13, %s2755_s13 }
  0x71   :  { %v196_v36 = vpop.permute.xlu2 %195 }
  0x76   :  { %784 = vrot.lane.b32.xlu0 %v2809_v6, %s2755_s13  ;;  %786 = vrot.lane.b32.xlu1 %v2821_v12, %s2755_s13 }
  0x77   :  { %788 = vrot.lane.b32.xlu2 %v2813_v8, %s2755_s13 }
  0x78   :  { %v59_v21 = vpop.permute.xlu1 %58  ;;  %v55_v22 = vpop.permute.xlu0 %54 }
  0x79   :  { %v202_v44 = vpop.permute.xlu2 %201 }
  0x7e   :  { %790 = vrot.lane.b32.xlu0 %v2828_v15, %s2755_s13  ;;  %792 = vrot.lane.b32.xlu1 %v2836_v18, %s2755_s13 }
  0x7f   :  { %794 = vrot.lane.b32.xlu2 %v2838_v19, %s2755_s13 }
  0x80   :  { %v61_v25 = vpop.permute.xlu1 %60  ;;  %v57_v26 = vpop.permute.xlu0 %56 }
  0x81   :  { %v71_v28 = vsel %vm70_vm0, %v55_v22, %v57_v26  ;;  %v72_v29 = vsel %vm70_vm0, %v57_v26, %v59_v21  ;;  %v73_v30 = vsel %vm70_vm0, %v59_v21, %v61_v25  ;;  %v74_v31 = vsel %vm70_vm0, %v61_v25, %v63_v20  ;;  %v208_v54 = vpop.permute.xlu2 %207 }
  0x82   :  { %v84_v32 = vsel %vm82_vm1, %v71_v28, 0  ;;  %v87_v33 = vsel %vm82_vm1, %v72_v29, 0  ;;  %v90_v34 = vsel %vm82_vm1, %v73_v30, 0  ;;  %v93_v35 = vsel %vm82_vm1, %v74_v31, 0  ;;  %v2620_v31 = vld [vmem:[%s3653_s2 + $0x8] sm:$0xf] }
  0x83   :  { %111 = vmatpush.bf16.msra.mxu0 %v84_v32  ;;  %124 = vmatpush.bf16.msra.mxu1 %v87_v33 }
  0x84   :  { %137 = vmatpush.bf16.msra.mxu2 %v90_v34  ;;  %150 = vmatpush.bf16.msra.mxu3 %v93_v35 }
  0x86   :  { %2606 = vmatmul.msk.bf16.vlgmr.msra.gmra.mxu0 %vm78_vm2, %v2605_v37  ;;  %2607 = vmatmul.msk.bf16.vlgmr.msra.gmra.mxu1 %vm78_vm2, %v2605_v37 }
  0x87   :  { %163 = vmatpush.bf16.msrb.mxu0 %v96_v27  ;;  %2608 = vmatmul.msk.bf16.vlgmr.msra.gmra.mxu2 %vm78_vm2, %v2605_v37 }
  0x88   :  { %2609 = vmatmul.msk.bf16.vlgmr.msra.gmra.mxu3 %vm78_vm2, %v2605_v37  ;;  %v67_v38 = vpop.permute.xlu0 %66  ;;  %v69_v39 = vpop.permute.xlu1 %68  ;;  %928 = vrot.lane.b32.xlu0 %v2811_v7, %s2756_s16 }
  0x89   :  { %930 = vrot.lane.b32.xlu1 %v2823_v13, %s2756_s16  ;;  %v76_v40 = vsel %vm70_vm0, %v65_v23, %v67_v38  ;;  %v77_v41 = vsel %vm70_vm0, %v67_v38, %v69_v39  ;;  %932 = vrot.lane.b32.xlu2 %v2809_v6, %s2756_s16  ;;  %v339_v63 = vpop.permute.xlu2 %338 }
  0x8a   :  { %v99_v42 = vsel %vm82_vm1, %v76_v40, 0  ;;  %v102_v43 = vsel %vm82_vm1, %v77_v41, 0 }
  0x8b   :  { %176 = vmatpush.bf16.msrb.mxu1 %v99_v42  ;;  %189 = vmatpush.bf16.msrb.mxu2 %v102_v43 }
  0x90   :  { %v198_v45 = vpop.permute.xlu0 %197  ;;  %v200_v46 = vpop.permute.xlu1 %199  ;;  %934 = vrot.lane.b32.xlu0 %v2821_v12, %s2756_s16 }
  0x91   :  { %936 = vrot.lane.b32.xlu1 %v2813_v8, %s2756_s16  ;;  %v213_v47 = vsel %vm211_vm3, %v198_v45, %v200_v46  ;;  %v212_v48 = vsel %vm211_vm3, %v196_v36, %v198_v45  ;;  %v214_v49 = vsel %vm211_vm3, %v200_v46, %v202_v44  ;;  %938 = vrot.lane.b32.xlu2 %v2828_v15, %s2756_s16  ;;  %v345_v9 = vpop.permute.xlu2 %344 }
  0x92   :  { %v226_v50 = vsel %vm82_vm1, %v213_v47, 0  ;;  %v223_v51 = vsel %vm82_vm1, %v212_v48, 0  ;;  %v229_v52 = vsel %vm82_vm1, %v214_v49, 0 }
  0x93   :  { %250 = vmatpush.bf16.msrb.mxu3 %v223_v51  ;;  %263 = vmatpush.bf16.msra.mxu0 %v226_v50 }
  0x94   :  { %276 = vmatpush.bf16.msra.mxu1 %v229_v52 }
  0x96   :  { %2610 = vmatmul.msk.bf16.vlgmr.msrb.gmra.mxu0 %vm78_vm2, %v2605_v37  ;;  %2611 = vmatmul.msk.bf16.vlgmr.msrb.gmra.mxu1 %vm78_vm2, %v2605_v37 }
  0x97   :  { %2612 = vmatmul.msk.bf16.vlgmr.msrb.gmra.mxu2 %vm78_vm2, %v2605_v37 }
  0x98   :  { %2613 = vmatmul.msk.bf16.vlgmr.msrb.gmra.mxu3 %vm78_vm2, %v2966_v53  ;;  %v206_v55 = vpop.permute.xlu1 %205  ;;  %v204_v56 = vpop.permute.xlu0 %203  ;;  %940 = vrot.lane.b32.xlu0 %v2836_v18, %s2756_s16 }
  0x99   :  { %942 = vrot.lane.b32.xlu1 %v2838_v19, %s2756_s16  ;;  %v215_v57 = vsel %vm211_vm3, %v202_v44, %v204_v56  ;;  %v216_v58 = vsel %vm211_vm3, %v204_v56, %v206_v55  ;;  %v217_v59 = vsel %vm211_vm3, %v206_v55, %v208_v54  ;;  %1076 = vrot.lane.b32.xlu2 %v2811_v7, %s2757_s19  ;;  %v351_v23 = vpop.permute.xlu2 %350 }
  0x9a   :  { %v232_v60 = vsel %vm82_vm1, %v215_v57, 0  ;;  %v235_v61 = vsel %vm82_vm1, %v216_v58, 0  ;;  %v238_v62 = vsel %vm82_vm1, %v217_v59, 0 }
  0x9b   :  { %289 = vmatpush.bf16.msra.mxu2 %v232_v60  ;;  %302 = vmatpush.bf16.msra.mxu3 %v235_v61 }
  0x9c   :  { %315 = vmatpush.bf16.msrb.mxu0 %v238_v62 }
  0xa0   :  { %v210_v0 = vpop.permute.xlu0 %209  ;;  %v337_v1 = vpop.permute.xlu1 %336  ;;  %1078 = vrot.lane.b32.xlu0 %v2823_v13, %s2757_s19 }
  0xa1   :  { %1080 = vrot.lane.b32.xlu1 %v2809_v6, %s2757_s19  ;;  %v218_v2 = vsel %vm211_vm3, %v208_v54, %v210_v0  ;;  %v353_v3 = vsel %vm352_vm4, %v337_v1, %v339_v63  ;;  %1082 = vrot.lane.b32.xlu2 %v2821_v12, %s2757_s19 }
  0xa2   :  { %v241_v4 = vsel %vm82_vm1, %v218_v2, 0  ;;  %v364_v5 = vsel %vm82_vm1, %v353_v3, 0 }
  0xa3   :  { %328 = vmatpush.bf16.msrb.mxu1 %v241_v4  ;;  %391 = vmatpush.bf16.msrb.mxu2 %v364_v5 }
  0xa6   :  { %2614 = vmatmul.msk.bf16.vlgmr.msra.gmra.mxu0 %vm78_vm2, %v2966_v53  ;;  %2615 = vmatmul.msk.bf16.vlgmr.msra.gmra.mxu1 %vm78_vm2, %v2966_v53 }
  0xa7   :  { %2616 = vmatmul.msk.bf16.vlgmr.msra.gmra.mxu2 %vm78_vm2, %v2966_v53 }
  0xa8   :  { %2617 = vmatmul.msk.bf16.vlgmr.msra.gmra.mxu3 %vm78_vm2, %v2966_v53  ;;  %v341_v10 = vpop.permute.xlu0 %340  ;;  %v343_v11 = vpop.permute.xlu1 %342  ;;  %1084 = vrot.lane.b32.xlu0 %v2813_v8, %s2757_s19 }
  0xa9   :  { %1086 = vrot.lane.b32.xlu1 %v2828_v15, %s2757_s19  ;;  %v354_v14 = vsel %vm352_vm4, %v339_v63, %v341_v10  ;;  %v355_v16 = vsel %vm352_vm4, %v341_v10, %v343_v11  ;;  %v356_v17 = vsel %vm352_vm4, %v343_v11, %v345_v9  ;;  %1088 = vrot.lane.b32.xlu2 %v2836_v18, %s2757_s19 }
  0xaa   :  { %v367_v20 = vsel %vm82_vm1, %v354_v14, 0  ;;  %v370_v21 = vsel %vm82_vm1, %v355_v16, 0  ;;  %v373_v22 = vsel %vm82_vm1, %v356_v17, 0 }
  0xab   :  { %404 = vmatpush.bf16.msrb.mxu3 %v367_v20  ;;  %417 = vmatpush.bf16.msra.mxu0 %v370_v21 }
  0xac   :  { %430 = vmatpush.bf16.msra.mxu1 %v373_v22 }
  0xb0   :  { %v349_v24 = vpop.permute.xlu1 %348  ;;  %v347_v25 = vpop.permute.xlu0 %346  ;;  %1090 = vrot.lane.b32.xlu0 %v2838_v19, %s2757_s19 }
  0xb1   :  { %1224 = vrot.lane.b32.xlu1 %v2811_v7, %s2758_s20  ;;  %v357_v26 = vsel %vm352_vm4, %v345_v9, %v347_v25  ;;  %v358_v27 = vsel %vm352_vm4, %v347_v25, %v349_v24  ;;  %1226 = vrot.lane.b32.xlu2 %v2823_v13, %s2758_s20  ;;  %v359_v30 = vsel %vm352_vm4, %v349_v24, %v351_v23  ;;  %v489_v13 = vpop.permute.xlu2 %488  ;;  %v2636_v24 = vld [vmem:[%s3653_s2 + $0x10] sm:$0xf] }
  0xb2   :  { %v376_v28 = vsel %vm82_vm1, %v357_v26, 0  ;;  %v379_v29 = vsel %vm82_vm1, %v358_v27, 0  ;;  %v382_v7 = vsel %vm82_vm1, %v359_v30, 0 }
  0xb3   :  { %443 = vmatpush.bf16.msra.mxu2 %v376_v28  ;;  %456 = vmatpush.bf16.msra.mxu3 %v379_v29 }
  0xb6   :  { %2618 = vmatmul.msk.bf16.vlgmr.msrb.gmra.mxu0 %vm78_vm2, %v2966_v53  ;;  %2619 = vmatmul.msk.bf16.vlgmr.msrb.gmra.mxu1 %vm78_vm2, %v2966_v53  ;;  %v2628_v53 = vld [vmem:[%s3653_s2 + $0xc] sm:$0xf] }
  0xb7   :  { %2621 = vmatmul.msk.bf16.vlgmr.msrb.gmra.mxu2 %vm78_vm2, %v2620_v31  ;;  %469 = vmatpush.bf16.msrb.mxu0 %v382_v7 }
  0xb8   :  { %2622 = vmatmul.msk.bf16.vlgmr.msrb.gmra.mxu3 %vm78_vm2, %v2620_v31  ;;  %v485_v32 = vpop.permute.xlu0 %484  ;;  %v487_v33 = vpop.permute.xlu1 %486  ;;  %1228 = vrot.lane.b32.xlu0 %v2809_v6, %s2758_s20 }
  0xb9   :  { %v501_v34 = vsel %vm500_vm5, %v485_v32, %v487_v33  ;;  %v502_v35 = vsel %vm500_vm5, %v487_v33, %v489_v13  ;;  %1230 = vrot.lane.b32.xlu1 %v2821_v12, %s2758_s20  ;;  %1232 = vrot.lane.b32.xlu2 %v2813_v8, %s2758_s20  ;;  %v495_v38 = vpop.permute.xlu2 %494 }
  0xba   :  { %v512_v36 = vsel %vm82_vm1, %v501_v34, 0  ;;  %v515_v37 = vsel %vm82_vm1, %v502_v35, 0 }
  0xbb   :  { %539 = vmatpush.bf16.msrb.mxu1 %v512_v36  ;;  %552 = vmatpush.bf16.msrb.mxu2 %v515_v37 }
  0xc0   :  { %v491_v39 = vpop.permute.xlu0 %490  ;;  %v493_v40 = vpop.permute.xlu1 %492  ;;  %1234 = vrot.lane.b32.xlu0 %v2828_v15, %s2758_s20 }
  0xc1   :  { %v503_v6 = vsel %vm500_vm5, %v489_v13, %v491_v39  ;;  %1236 = vrot.lane.b32.xlu1 %v2836_v18, %s2758_s20  ;;  %1238 = vrot.lane.b32.xlu2 %v2838_v19, %s2758_s20  ;;  %v504_v12 = vsel %vm500_vm5, %v491_v39, %v493_v40  ;;  %v505_v41 = vsel %vm500_vm5, %v493_v40, %v495_v38  ;;  %v633_v15 = vpop.permute.xlu2 %632  ;;  %v3117_v40 = vld [vmem:[%s3653_s2 + $0x14] sm:$0xf] }
  0xc2   :  { %v518_v8 = vsel %vm82_vm1, %v503_v6, 0  ;;  %v521_v42 = vsel %vm82_vm1, %v504_v12, 0  ;;  %v524_v43 = vsel %vm82_vm1, %v505_v41, 0 }
  0xc3   :  { %565 = vmatpush.bf16.msrb.mxu3 %v518_v8 }
  0xc6   :  { %2623 = vmatmul.msk.bf16.vlgmr.msra.gmra.mxu0 %vm78_vm2, %v2620_v31  ;;  %2624 = vmatmul.msk.bf16.vlgmr.msra.gmra.mxu1 %vm78_vm2, %v2620_v31 }
  0xc7   :  { %2625 = vmatmul.msk.bf16.vlgmr.msra.gmra.mxu2 %vm78_vm2, %v2620_v31  ;;  %578 = vmatpush.bf16.msra.mxu0 %v521_v42 }
  0xc8   :  { %2626 = vmatmul.msk.bf16.vlgmr.msra.gmra.mxu3 %vm78_vm2, %v2620_v31  ;;  %591 = vmatpush.bf16.msra.mxu1 %v524_v43  ;;  %v499_v18 = vpop.permute.xlu1 %498  ;;  %v497_v19 = vpop.permute.xlu0 %496 }
  0xc9   :  { %v506_v44 = vsel %vm500_vm5, %v495_v38, %v497_v19  ;;  %v507_v45 = vsel %vm500_vm5, %v497_v19, %v499_v18  ;;  %v639_v48 = vpop.permute.xlu2 %638 }
  0xca   :  { %v527_v46 = vsel %vm82_vm1, %v506_v44, 0  ;;  %v530_v47 = vsel %vm82_vm1, %v507_v45, 0 }
  0xcb   :  { %604 = vmatpush.bf16.msra.mxu2 %v527_v46  ;;  %617 = vmatpush.bf16.msra.mxu3 %v530_v47 }
  0xd0   :  { %v635_v49 = vpop.permute.xlu0 %634  ;;  %v637_v50 = vpop.permute.xlu1 %636 }
  0xd1   :  { %v649_v51 = vsel %vm648_vm6, %v633_v15, %v635_v49  ;;  %v650_v52 = vsel %vm648_vm6, %v635_v49, %v637_v50  ;;  %v651_v54 = vsel %vm648_vm6, %v637_v50, %v639_v48  ;;  %v645_v58 = vpop.permute.xlu2 %644 }
  0xd2   :  { %v660_v55 = vsel %vm82_vm1, %v649_v51, 0  ;;  %v663_v56 = vsel %vm82_vm1, %v650_v52, 0  ;;  %v666_v57 = vsel %vm82_vm1, %v651_v54, 0 }
  0xd6   :  { %2627 = vmatmul.msk.bf16.vlgmr.msrb.gmra.mxu0 %vm78_vm2, %v2620_v31  ;;  %2629 = vmatmul.msk.bf16.vlgmr.msrb.gmra.mxu1 %vm78_vm2, %v2628_v53 }
  0xd7   :  { %2630 = vmatmul.msk.bf16.vlgmr.msrb.gmra.mxu2 %vm78_vm2, %v2628_v53  ;;  %687 = vmatpush.bf16.msrb.mxu0 %v660_v55 }
  0xd8   :  { %2631 = vmatmul.msk.bf16.vlgmr.msrb.gmra.mxu3 %vm78_vm2, %v2628_v53  ;;  %700 = vmatpush.bf16.msrb.mxu1 %v663_v56  ;;  %v641_v59 = vpop.permute.xlu0 %640  ;;  %v643_v60 = vpop.permute.xlu1 %642 }
  0xd9   :  { %v652_v61 = vsel %vm648_vm6, %v639_v48, %v641_v59  ;;  %713 = vmatpush.bf16.msrb.mxu2 %v666_v57  ;;  %v783_v63 = vpop.permute.xlu2 %782  ;;  %v653_v2 = vsel %vm648_vm6, %v641_v59, %v643_v60  ;;  %v654_v3 = vsel %vm648_vm6, %v643_v60, %v645_v58 }
  0xda   :  { %v669_v62 = vsel %vm82_vm1, %v652_v61, 0  ;;  %v672_v9 = vsel %vm82_vm1, %v653_v2, 0  ;;  %v675_v10 = vsel %vm82_vm1, %v654_v3, 0 }
  0xdb   :  { %726 = vmatpush.bf16.msrb.mxu3 %v669_v62 }
  0xe0   :  { %v647_v0 = vpop.permute.xlu0 %646  ;;  %v781_v1 = vpop.permute.xlu1 %780 }
  0xe1   :  { %v655_v4 = vsel %vm648_vm6, %v645_v58, %v647_v0  ;;  %v797_v5 = vsel %vm796_vm7, %v781_v1, %v783_v63  ;;  %v789_v17 = vpop.permute.xlu2 %788 }
  0xe2   :  { %v678_v11 = vsel %vm82_vm1, %v655_v4, 0  ;;  %v808_v14 = vsel %vm82_vm1, %v797_v5, 0 }
  0xe6   :  { %2632 = vmatmul.msk.bf16.vlgmr.msra.gmra.mxu0 %vm78_vm2, %v2628_v53  ;;  %2633 = vmatmul.msk.bf16.vlgmr.msra.gmra.mxu1 %vm78_vm2, %v2628_v53 }
  0xe7   :  { %2634 = vmatmul.msk.bf16.vlgmr.msra.gmra.mxu2 %vm78_vm2, %v2628_v53  ;;  %739 = vmatpush.bf16.msra.mxu0 %v672_v9 }
  0xe8   :  { %2635 = vmatmul.msk.bf16.vlgmr.msra.gmra.mxu3 %vm78_vm2, %v2628_v53  ;;  %752 = vmatpush.bf16.msra.mxu1 %v675_v10  ;;  %v785_v16 = vpop.permute.xlu0 %784  ;;  %v787_v20 = vpop.permute.xlu1 %786 }
  0xe9   :  { %765 = vmatpush.bf16.msra.mxu2 %v678_v11  ;;  %835 = vmatpush.bf16.msra.mxu3 %v808_v14  ;;  %v798_v22 = vsel %vm796_vm7, %v783_v63, %v785_v16  ;;  %v799_v23 = vsel %vm796_vm7, %v785_v16, %v787_v20  ;;  %v800_v25 = vsel %vm796_vm7, %v787_v20, %v789_v17  ;;  %v795_v31 = vpop.permute.xlu2 %794 }
  0xea   :  { %v811_v27 = vsel %vm82_vm1, %v798_v22, 0  ;;  %v814_v28 = vsel %vm82_vm1, %v799_v23, 0  ;;  %v817_v29 = vsel %vm82_vm1, %v800_v25, 0  ;;  %v3160_v23 = vld [vmem:[%s3653_s2 + $0x18] sm:$0xf] }
  0xf0   :  { %v791_v21 = vpop.permute.xlu0 %790  ;;  %v793_v7 = vpop.permute.xlu1 %792 }
  0xf1   :  { %v801_v26 = vsel %vm796_vm7, %v789_v17, %v791_v21  ;;  %v933_v33 = vpop.permute.xlu2 %932  ;;  %v802_v34 = vsel %vm796_vm7, %v791_v21, %v793_v7  ;;  %v803_v35 = vsel %vm796_vm7, %v793_v7, %v795_v31 }
  0xf2   :  { %v820_v30 = vsel %vm82_vm1, %v801_v26, 0  ;;  %v823_v6 = vsel %vm82_vm1, %v802_v34, 0  ;;  %v826_v8 = vsel %vm82_vm1, %v803_v35, 0 }
  0xf6   :  { %2637 = vmatmul.msk.bf16.vlgmr.msrb.gmra.mxu0 %vm78_vm2, %v2636_v24  ;;  %2638 = vmatmul.msk.bf16.vlgmr.msrb.gmra.mxu1 %vm78_vm2, %v2636_v24 }
  0xf7   :  { %2639 = vmatmul.msk.bf16.vlgmr.msrb.gmra.mxu2 %vm78_vm2, %v2636_v24  ;;  %848 = vmatpush.bf16.msrb.mxu0 %v811_v27 }
  0xf8   :  { %2640 = vmatmul.msk.bf16.vlgmr.msrb.gmra.mxu3 %vm78_vm2, %v2636_v24  ;;  %861 = vmatpush.bf16.msrb.mxu1 %v814_v28 }
  0xf9   :  { %874 = vmatpush.bf16.msrb.mxu2 %v817_v29  ;;  %887 = vmatpush.bf16.msrb.mxu3 %v820_v30  ;;  %v939_v44 = vpop.permute.xlu2 %938 }
  0xfa   :  { %v929_v13 = vpop.permute.xlu0 %928 }
  0xfb   :  { %v931_v32 = vpop.permute.xlu1 %930 }
  0xfc   :  { %v945_v38 = vsel %vm944_vm8, %v929_v13, %v931_v32  ;;  %v946_v39 = vsel %vm944_vm8, %v931_v32, %v933_v33 }
  0xfd   :  { %v956_v12 = vsel %vm82_vm1, %v945_v38, 0  ;;  %v959_v41 = vsel %vm82_vm1, %v946_v39, 0 }
 0x101   :  { %v1077_v59 = vpop.permute.xlu2 %1076 }
 0x102   :  { %v935_v42 = vpop.permute.xlu0 %934 }
 0x103   :  { %v113_v36 = vpop.f32.mrf.mxu0  ;;  %v3110_v37 = vpop.f32.mrf.mxu1  ;;  %v947_v49 = vsel %vm944_vm8, %v933_v33, %v935_v42 }
 0x104   :  { %v937_v45 = vpop.permute.xlu1 %936  ;;  %v962_v55 = vsel %vm82_vm1, %v947_v49, 0 }
 0x105   :  { %v948_v50 = vsel %vm944_vm8, %v935_v42, %v937_v45  ;;  %v949_v53 = vsel %vm944_vm8, %v937_v45, %v939_v44 }
 0x106   :  { %2641 = vmatmul.msk.bf16.vlgmr.msra.gmra.mxu0 %vm78_vm2, %v2636_v24  ;;  %2642 = vmatmul.msk.bf16.vlgmr.msra.gmra.mxu1 %vm78_vm2, %v2636_v24  ;;  %v965_v56 = vsel %vm82_vm1, %v948_v50, 0  ;;  %v968_v57 = vsel %vm82_vm1, %v949_v53, 0 }
 0x107   :  { %2643 = vmatmul.msk.bf16.vlgmr.msra.gmra.mxu2 %vm78_vm2, %v2636_v24  ;;  %900 = vmatpush.bf16.msra.mxu0 %v823_v6 }
 0x108   :  { %2645 = vmatmul.msk.bf16.vlgmr.msra.gmra.mxu3 %vm78_vm2, %v3117_v40  ;;  %913 = vmatpush.bf16.msra.mxu1 %v826_v8 }
 0x109   :  { %983 = vmatpush.bf16.msra.mxu2 %v956_v12  ;;  %996 = vmatpush.bf16.msra.mxu3 %v959_v41  ;;  %v1083_v4 = vpop.permute.xlu2 %1082 }
 0x10a   :  { %v139_v43 = vpop.f32.mrf.mxu2  ;;  %v941_v46 = vpop.permute.xlu0 %940 }
 0x10b   :  { %v3128_v15 = vpop.f32.mrf.mxu3  ;;  %v115_v18 = vpop.f32.mrf.mxu0  ;;  %v950_v54 = vsel %vm944_vm8, %v939_v44, %v941_v46 }
 0x10c   :  { %v128_v19 = vpop.f32.mrf.mxu1  ;;  %v971_v58 = vsel %vm82_vm1, %v950_v54, 0  ;;  %v943_v60 = vpop.permute.xlu1 %942 }
 0x10d   :  { %v951_v10 = vsel %vm944_vm8, %v941_v46, %v943_v60 }
 0x10e   :  { %v974_v24 = vsel %vm82_vm1, %v951_v10, 0 }
 0x111   :  { %v1089_v33 = vpop.permute.xlu2 %1088 }
 0x112   :  { %v141_v47 = vpop.f32.mrf.mxu2  ;;  %v1079_v2 = vpop.permute.xlu0 %1078 }
 0x113   :  { %v154_v48 = vpop.f32.mrf.mxu3  ;;  %v165_v51 = vpop.f32.mrf.mxu0  ;;  %v1093_v11 = vsel %vm1092_vm9, %v1077_v59, %v1079_v2 }
 0x114   :  { %v3132_v52 = vpop.f32.mrf.mxu1  ;;  %v1081_v3 = vpop.permute.xlu1 %1080  ;;  %v1104_v25 = vsel %vm82_vm1, %v1093_v11, 0 }
 0x115   :  { %v1094_v17 = vsel %vm1092_vm9, %v1079_v2, %v1081_v3  ;;  %v1095_v20 = vsel %vm1092_vm9, %v1081_v3, %v1083_v4 }
 0x116   :  { %2646 = vmatmul.msk.bf16.vlgmr.msrb.gmra.mxu0 %vm78_vm2, %v3117_v40  ;;  %2647 = vmatmul.msk.bf16.vlgmr.msrb.gmra.mxu1 %vm78_vm2, %v3117_v40  ;;  %v1107_v26 = vsel %vm82_vm1, %v1094_v17, 0  ;;  %v1110_v27 = vsel %vm82_vm1, %v1095_v20, 0 }
 0x117   :  { %2648 = vmatmul.msk.bf16.vlgmr.msrb.gmra.mxu2 %vm78_vm2, %v3117_v40  ;;  %1009 = vmatpush.bf16.msrb.mxu0 %v962_v55 }
 0x118   :  { %2649 = vmatmul.msk.bf16.vlgmr.msrb.gmra.mxu3 %vm78_vm2, %v3117_v40  ;;  %1022 = vmatpush.bf16.msrb.mxu1 %v965_v56 }
 0x119   :  { %1035 = vmatpush.bf16.msrb.mxu2 %v968_v57  ;;  %1048 = vmatpush.bf16.msrb.mxu3 %v971_v58  ;;  %v1227_v45 = vpop.permute.xlu2 %1226 }
 0x11a   :  { %v191_v61 = vpop.f32.mrf.mxu2  ;;  %v1085_v28 = vpop.permute.xlu0 %1084 }
 0x11b   :  { %v252_v62 = vpop.f32.mrf.mxu3  ;;  %v167_v0 = vpop.f32.mrf.mxu0  ;;  %v1096_v38 = vsel %vm1092_vm9, %v1083_v4, %v1085_v28 }
 0x11c   :  { %v3148_v63 = vadd.f32 %v252_v62, %v113_v36  ;;  %v180_v1 = vpop.f32.mrf.mxu1  ;;  %v1087_v34 = vpop.permute.xlu1 %1086 }
 0x11d   :  { %v1097_v39 = vsel %vm1092_vm9, %v1085_v28, %v1087_v34  ;;  %v1098_v8 = vsel %vm1092_vm9, %v1087_v34, %v1089_v33 }
 0x11e   :  { %v1119_v18 = vsel %vm82_vm1, %v1098_v8, 0 }
 0x121   :  { %v1233_v54 = vpop.permute.xlu2 %1232 }
 0x122   :  { %v193_v5 = vpop.f32.mrf.mxu2  ;;  %v1091_v35 = vpop.permute.xlu0 %1090 }
 0x123   :  { %v254_v9 = vpop.f32.mrf.mxu3  ;;  %v265_v14 = vpop.f32.mrf.mxu0  ;;  %v1099_v12 = vsel %vm1092_vm9, %v1089_v33, %v1091_v35 }
 0x124   :  { %v278_v16 = vpop.f32.mrf.mxu1  ;;  %v266_v21 = vadd.f32 %v265_v14, %v3110_v37  ;;  %v1122_v19 = vsel %vm82_vm1, %v1099_v12, 0  ;;  %v1225_v44 = vpop.permute.xlu1 %1224 }
 0x125   :  { %v3155_v22 = vadd.f32 %v278_v16, %v139_v43  ;;  %v1113_v43 = vsel %vm82_vm1, %v1096_v38, 0  ;;  %v1241_v57 = vsel %vm1240_vm10, %v1225_v44, %v1227_v45 }
 0x126   :  { %2650 = vmatmul.msk.bf16.vlgmr.msra.gmra.mxu0 %vm78_vm2, %v3117_v40  ;;  %2651 = vmatmul.msk.bf16.vlgmr.msra.gmra.mxu1 %vm78_vm2, %v3117_v40  ;;  %v1252_v2 = vsel %vm82_vm1, %v1241_v57, 0 }
 0x127   :  { %2653 = vmatmul.msk.bf16.vlgmr.msra.gmra.mxu2 %vm78_vm2, %v3160_v23  ;;  %1061 = vmatpush.bf16.msra.mxu0 %v974_v24 }
 0x128   :  { %2654 = vmatmul.msk.bf16.vlgmr.msra.gmra.mxu3 %vm78_vm2, %v3160_v23  ;;  %1131 = vmatpush.bf16.msra.mxu1 %v1104_v25 }
 0x129   :  { %1144 = vmatpush.bf16.msra.mxu2 %v1107_v26  ;;  %1157 = vmatpush.bf16.msra.mxu3 %v1110_v27  ;;  %v1370_v27 = vld [vmem:[%s3654_s4] sm:$0xff] }
 0x12a   :  { %v291_v29 = vpop.f32.mrf.mxu2 }
 0x12b   :  { %v304_v30 = vpop.f32.mrf.mxu3  ;;  %v292_v31 = vadd.f32 %v291_v29, %v3128_v15  ;;  %v267_v13 = vpop.f32.mrf.mxu0  ;;  %v1116_v15 = vsel %vm82_vm1, %v1097_v39, 0 }
 0x12c   :  { %v3175_v7 = vadd.f32 %v304_v30, %v165_v51  ;;  %v280_v32 = vpop.f32.mrf.mxu1  ;;  %v1231_v53 = vpop.permute.xlu1 %1230 }
 0x132   :  { %v293_v36 = vpop.f32.mrf.mxu2 }
 0x133   :  { %v306_v37 = vpop.f32.mrf.mxu3  ;;  %v317_v40 = vpop.f32.mrf.mxu0 }
 0x134   :  { %v330_v6 = vpop.f32.mrf.mxu1  ;;  %v318_v41 = vadd.f32 %v317_v40, %v3132_v52  ;;  %v1229_v52 = vpop.permute.xlu0 %1228 }
 0x135   :  { %v3182_v42 = vadd.f32 %v330_v6, %v191_v61  ;;  %v1242_v58 = vsel %vm1240_vm10, %v1227_v45, %v1229_v52  ;;  %v2660_v61 = vld [vmem:[%s3653_s2 + $0x1c] sm:$0xf]  ;;  %v1243_v62 = vsel %vm1240_vm10, %v1229_v52, %v1231_v53 }
 0x136   :  { %2655 = vmatmul.msk.bf16.vlgmr.msrb.gmra.mxu0 %vm78_vm2, %v3160_v23  ;;  %2656 = vmatmul.msk.bf16.vlgmr.msrb.gmra.mxu1 %vm78_vm2, %v3160_v23  ;;  %v1255_v3 = vsel %vm82_vm1, %v1242_v58, 0  ;;  %v1258_v4 = vsel %vm82_vm1, %v1243_v62, 0 }
 0x137   :  { %2657 = vmatmul.msk.bf16.vlgmr.msrb.gmra.mxu2 %vm78_vm2, %v3160_v23  ;;  %1170 = vmatpush.bf16.msrb.mxu0 %v1113_v43 }
 0x138   :  { %2658 = vmatmul.msk.bf16.vlgmr.msrb.gmra.mxu3 %vm78_vm2, %v3160_v23  ;;  %1183 = vmatpush.bf16.msrb.mxu1 %v1116_v15 }
 0x139   :  { %1196 = vmatpush.bf16.msrb.mxu2 %v1119_v18  ;;  %1209 = vmatpush.bf16.msrb.mxu3 %v1122_v19 }
 0x13a   :  { %v393_v46 = vpop.f32.mrf.mxu2 }
 0x13b   :  { %v406_v47 = vpop.f32.mrf.mxu3  ;;  %v475_v48 = vadd.f32 %v393_v46, %v3148_v63  ;;  %v319_v50 = vpop.f32.mrf.mxu0  ;;  %v1244_v63 = vsel %vm1240_vm10, %v1231_v53, %v1233_v54 }
 0x13c   :  { %v3197_v49 = vadd.f32 %v406_v47, %v266_v21  ;;  %v332_v51 = vpop.f32.mrf.mxu1  ;;  %v1261_v5 = vsel %vm82_vm1, %v1244_v63, 0  ;;  %v1235_v20 = vpop.permute.xlu0 %1234 }
 0x13d   :  { %v1237_v21 = vpop.permute.xlu1 %1236  ;;  %v1245_v25 = vsel %vm1240_vm10, %v1233_v54, %v1235_v20 }
 0x13e   :  { %v1246_v26 = vsel %vm1240_vm10, %v1235_v20, %v1237_v21  ;;  %v1264_v32 = vsel %vm82_vm1, %v1245_v25, 0 }
 0x13f   :  { %v1267_v33 = vsel %vm82_vm1, %v1246_v26, 0 }
 0x142   :  { %v395_v55 = vpop.f32.mrf.mxu2 }
 0x143   :  { %v408_v56 = vpop.f32.mrf.mxu3  ;;  %v419_v59 = vpop.f32.mrf.mxu0 }
 0x144   :  { %v432_v60 = vpop.f32.mrf.mxu1  ;;  %v477_v0 = vadd.f32 %v419_v59, %v3155_v22  ;;  %v1239_v22 = vpop.permute.xlu2 %1238 }
 0x145   :  { %v478_v1 = vadd.f32 %v432_v60, %v292_v31  ;;  %v1247_v30 = vsel %vm1240_vm10, %v1237_v21, %v1239_v22  ;;  %v2759_v31 = vmov 0  }
 0x146   :  { %2659 = vmatmul.msk.bf16.vlgmr.msra.gmra.mxu0 %vm78_vm2, %v3160_v23  ;;  %2661 = vmatmul.msk.bf16.vlgmr.msra.gmra.mxu1 %vm78_vm2, %v2660_v61  ;;  %v1270_v34 = vsel %vm82_vm1, %v1247_v30, 0 }
 0x147   :  { %2662 = vmatmul.msk.bf16.vlgmr.msra.gmra.mxu2 %vm78_vm2, %v2660_v61  ;;  %1279 = vmatpush.bf16.msra.mxu0 %v1252_v2 }
 0x148   :  { %2663 = vmatmul.msk.bf16.vlgmr.msra.gmra.mxu3 %vm78_vm2, %v2660_v61  ;;  %1292 = vmatpush.bf16.msra.mxu1 %v1255_v3 }
 0x149   :  { %1305 = vmatpush.bf16.msra.mxu2 %v1258_v4  ;;  %1318 = vmatpush.bf16.msra.mxu3 %v1261_v5 }
 0x14a   :  { %v445_v9 = vpop.f32.mrf.mxu2  ;;  %2748 = vset.pattern.permute.xlu0 %v2759_v31  ;;  %2749 = vset.pattern.permute.xlu2 %v2759_v31 }
 0x14b   :  { %v458_v10 = vpop.f32.mrf.mxu3  ;;  %v479_v11 = vadd.f32 %v445_v9, %v3175_v7  ;;  %v421_v16 = vpop.f32.mrf.mxu0  ;;  %1373 = vperm.xlu0 %2748, %v1370_v27  }
 0x14c   :  { %v480_v14 = vadd.f32 %v458_v10, %v318_v41  ;;  %v434_v17 = vpop.f32.mrf.mxu1 }
 0x152   :  { %v447_v23 = vpop.f32.mrf.mxu2 }
 0x153   :  { %v460_v24 = vpop.f32.mrf.mxu3  ;;  %v471_v28 = vpop.f32.mrf.mxu0 }
 0x154   :  { %v541_v29 = vpop.f32.mrf.mxu1  ;;  %v481_v7 = vadd.f32 %v471_v28, %v3182_v42  ;;  %v2668_v42 = vld [vmem:[%s3653_s2 + $0x20] sm:$0xf] }
 0x155   :  { %v623_v13 = vadd.f32 %v541_v29, %v475_v48 }
 0x156   :  { %2664 = vmatmul.msk.bf16.vlgmr.msrb.gmra.mxu0 %vm78_vm2, %v2660_v61  ;;  %2665 = vmatmul.msk.bf16.vlgmr.msrb.gmra.mxu1 %vm78_vm2, %v2660_v61 }
 0x157   :  { %2666 = vmatmul.msk.bf16.vlgmr.msrb.gmra.mxu2 %vm78_vm2, %v2660_v61  ;;  %1331 = vmatpush.bf16.msrb.mxu0 %v1264_v32 }
 0x158   :  { %2667 = vmatmul.msk.bf16.vlgmr.msrb.gmra.mxu3 %vm78_vm2, %v2660_v61  ;;  %1344 = vmatpush.bf16.msrb.mxu1 %v1267_v33 }
 0x159   :  { %1357 = vmatpush.bf16.msrb.mxu2 %v1270_v34 }
 0x15a   :  { %v554_v35 = vpop.f32.mrf.mxu2 }
 0x15b   :  { %v567_v36 = vpop.f32.mrf.mxu3  ;;  %v624_v37 = vadd.f32 %v554_v35, %v3197_v49  ;;  %v473_v39 = vpop.f32.mrf.mxu0 }
 0x15c   :  { %v625_v38 = vadd.f32 %v567_v36, %v477_v0  ;;  %v543_v40 = vpop.f32.mrf.mxu1 }
 0x162   :  { %v556_v6 = vpop.f32.mrf.mxu2 }
 0x163   :  { %v569_v8 = vpop.f32.mrf.mxu3  ;;  %v580_v12 = vpop.f32.mrf.mxu0 }
 0x164   :  { %v593_v41 = vpop.f32.mrf.mxu1  ;;  %v626_v43 = vadd.f32 %v580_v12, %v478_v1 }
 0x165   :  { %v627_v15 = vadd.f32 %v593_v41, %v479_v11 }
 0x166   :  { %2669 = vmatmul.msk.bf16.vlgmr.msra.gmra.mxu0 %vm78_vm2, %v2668_v42  ;;  %2670 = vmatmul.msk.bf16.vlgmr.msra.gmra.mxu1 %vm78_vm2, %v2668_v42 }
 0x167   :  { %2671 = vmatmul.msk.bf16.vlgmr.msra.gmra.mxu2 %vm78_vm2, %v2668_v42 }
 0x168   :  { %2672 = vmatmul.msk.bf16.vlgmr.msra.gmra.mxu3 %vm78_vm2, %v2668_v42 }
 0x16a   :  { %v606_v18 = vpop.f32.mrf.mxu2 }
 0x16b   :  { %v619_v19 = vpop.f32.mrf.mxu3  ;;  %v628_v44 = vadd.f32 %v606_v18, %v480_v14  ;;  %v582_v46 = vpop.f32.mrf.mxu0 }
 0x16c   :  { %v629_v45 = vadd.f32 %v619_v19, %v481_v7  ;;  %v595_v47 = vpop.f32.mrf.mxu1 }
 0x172   :  { %v608_v48 = vpop.f32.mrf.mxu2 }
 0x173   :  { %v621_v49 = vpop.f32.mrf.mxu3  ;;  %v689_v50 = vpop.f32.mrf.mxu0 }
 0x174   :  { %v702_v51 = vpop.f32.mrf.mxu1  ;;  %v771_v52 = vadd.f32 %v689_v50, %v623_v13 }
 0x175   :  { %v772_v53 = vadd.f32 %v702_v51, %v624_v37 }
 0x176   :  { %2673 = vmatmul.msk.bf16.vlgmr.msrb.gmra.mxu0 %vm78_vm2, %v2668_v42  ;;  %2674 = vmatmul.msk.bf16.vlgmr.msrb.gmra.mxu1 %vm78_vm2, %v2668_v42 }
 0x177   :  { %2675 = vmatmul.msk.bf16.vlgmr.msrb.gmra.mxu2 %vm78_vm2, %v2668_v42 }
 0x17a   :  { %v715_v54 = vpop.f32.mrf.mxu2 }
 0x17b   :  { %v728_v55 = vpop.f32.mrf.mxu3  ;;  %v773_v56 = vadd.f32 %v715_v54, %v625_v38  ;;  %v691_v58 = vpop.f32.mrf.mxu0 }
 0x17c   :  { %v774_v57 = vadd.f32 %v728_v55, %v626_v43  ;;  %v704_v59 = vpop.f32.mrf.mxu1 }
 0x182   :  { %v717_v60 = vpop.f32.mrf.mxu2 }
 0x183   :  { %v730_v61 = vpop.f32.mrf.mxu3  ;;  %v741_v62 = vpop.f32.mrf.mxu0 }
 0x184   :  { %v754_v63 = vpop.f32.mrf.mxu1  ;;  %v775_v0 = vadd.f32 %v741_v62, %v627_v15 }
 0x185   :  { %v776_v1 = vadd.f32 %v754_v63, %v628_v44  ;;  %v3257_v63 = vld [vmem:[%s3655_s6] sm:$0xff] }
 0x18a   :  { %v767_v2 = vpop.f32.mrf.mxu2 }
 0x18b   :  { %v837_v3 = vpop.f32.mrf.mxu3  ;;  %v777_v4 = vadd.f32 %v767_v2, %v629_v45  ;;  %v743_v9 = vpop.f32.mrf.mxu0  ;;  %v1392_v2 = vperm.slane %v3257_v63, 0 }
 0x18c   :  { %v919_v5 = vadd.f32 %v837_v3, %v771_v52  ;;  %v756_v10 = vpop.f32.mrf.mxu1  ;;  %v1393_v3 = vperm.slane %v3257_v63, 1 }
 0x192   :  { %v769_v11 = vpop.f32.mrf.mxu2 }
 0x193   :  { %v839_v14 = vpop.f32.mrf.mxu3  ;;  %v850_v16 = vpop.f32.mrf.mxu0 }
 0x194   :  { %v863_v17 = vpop.f32.mrf.mxu1  ;;  %v920_v20 = vadd.f32 %v850_v16, %v772_v53 }
 0x195   :  { %v921_v21 = vadd.f32 %v863_v17, %v773_v56 }
 0x19a   :  { %v876_v22 = vpop.f32.mrf.mxu2 }
 0x19b   :  { %v889_v23 = vpop.f32.mrf.mxu3  ;;  %v922_v24 = vadd.f32 %v876_v22, %v774_v57  ;;  %v852_v26 = vpop.f32.mrf.mxu0 }
 0x19c   :  { %v3242_v25 = vadd.f32 %v889_v23, %v775_v0  ;;  %v865_v27 = vpop.f32.mrf.mxu1 }
 0x1a2   :  { %v878_v28 = vpop.f32.mrf.mxu2 }
 0x1a3   :  { %v891_v29 = vpop.f32.mrf.mxu3  ;;  %v902_v30 = vpop.f32.mrf.mxu0 }
 0x1a4   :  { %v915_v31 = vpop.f32.mrf.mxu1  ;;  %v3244_v7 = vadd.f32 %v902_v30, %v776_v1 }
 0x1a5   :  { %v3246_v13 = vadd.f32 %v915_v31, %v777_v4 }
 0x1aa   :  { %v985_v32 = vpop.f32.mrf.mxu2 }
 0x1ab   :  { %v998_v33 = vpop.f32.mrf.mxu3  ;;  %v904_v34 = vpop.f32.mrf.mxu0  ;;  %v1067_v54 = vadd.f32 %v985_v32, %v919_v5 }
 0x1ac   :  { %v917_v35 = vpop.f32.mrf.mxu1  ;;  %v1068_v55 = vadd.f32 %v998_v33, %v920_v20  ;;  %v1394_v33 = vperm.slane %v3257_v63, 2 }
 0x1b2   :  { %v987_v36 = vpop.f32.mrf.mxu2 }
 0x1b3   :  { %v1000_v37 = vpop.f32.mrf.mxu3  ;;  %v1011_v38 = vpop.f32.mrf.mxu0 }
 0x1b4   :  { %v1024_v39 = vpop.f32.mrf.mxu1  ;;  %v1069_v9 = vadd.f32 %v1011_v38, %v921_v21 }
 0x1b5   :  { %v1070_v10 = vadd.f32 %v1024_v39, %v922_v24  ;;  %v1395_v24 = vperm.slane %v3257_v63, 3 }
 0x1ba   :  { %v1037_v40 = vpop.f32.mrf.mxu2 }
 0x1bb   :  { %v1050_v6 = vpop.f32.mrf.mxu3  ;;  %v1013_v8 = vpop.f32.mrf.mxu0  ;;  %v1071_v38 = vadd.f32 %v1037_v40, %v3242_v25 }
 0x1bc   :  { %v1026_v12 = vpop.f32.mrf.mxu1  ;;  %v1072_v39 = vadd.f32 %v1050_v6, %v3244_v7 }
 0x1bd   :  { %v3252_v56 = vpop.permute.xlu0 %1373 }
 0x1c2   :  { %v1039_v41 = vpop.f32.mrf.mxu2 }
 0x1c3   :  { %v1052_v42 = vpop.f32.mrf.mxu3  ;;  %v3248_v43 = vpop.f32.mrf.mxu0 }
 0x1c4   :  { %v1133_v15 = vpop.f32.mrf.mxu1 }
 0x1c5   :  { %v1215_v57 = vadd.f32 %v1133_v15, %v1067_v54 }
 0x1ca   :  { %v1146_v18 = vpop.f32.mrf.mxu2 }
 0x1cb   :  { %v1159_v19 = vpop.f32.mrf.mxu3  ;;  %v1065_v44 = vpop.f32.mrf.mxu0  ;;  %v1216_v58 = vadd.f32 %v1146_v18, %v1068_v55 }
 0x1cc   :  { %v1135_v45 = vpop.f32.mrf.mxu1  ;;  %v1217_v16 = vadd.f32 %v1159_v19, %v1069_v9 }
 0x1d2   :  { %v1148_v46 = vpop.f32.mrf.mxu2 }
 0x1d3   :  { %v1161_v47 = vpop.f32.mrf.mxu3  ;;  %v1172_v48 = vpop.f32.mrf.mxu0 }
 0x1d4   :  { %v1185_v49 = vpop.f32.mrf.mxu1  ;;  %v1218_v17 = vadd.f32 %v1172_v48, %v1070_v10 }
 0x1d5   :  { %v1219_v15 = vadd.f32 %v1185_v49, %v1071_v38  ;;  %v1396_v49 = vperm.slane %v3257_v63, 4 }
 0x1da   :  { %v1198_v50 = vpop.f32.mrf.mxu2 }
 0x1db   :  { %v3250_v51 = vpop.f32.mrf.mxu3  ;;  %v1174_v52 = vpop.f32.mrf.mxu0  ;;  %v1220_v18 = vadd.f32 %v1198_v50, %v1072_v39 }
 0x1dc   :  { %v1187_v53 = vpop.f32.mrf.mxu1  ;;  %v1397_v52 = vperm.slane %v3257_v63, 5 }
 0x1dd   :  { %v1073_v53 = vadd.f32 %v3248_v43, %v3246_v13 }
 0x1e2   :  { %v1200_v59 = vpop.f32.mrf.mxu2 }
 0x1e3   :  { %v1213_v60 = vpop.f32.mrf.mxu3  ;;  %v1281_v61 = vpop.f32.mrf.mxu0  ;;  %v1221_v59 = vadd.f32 %v3250_v51, %v1073_v53 }
 0x1e4   :  { %v1294_v62 = vpop.f32.mrf.mxu1  ;;  %v1363_v0 = vadd.f32 %v1281_v61, %v1215_v57 }
 0x1e5   :  { %v1364_v1 = vadd.f32 %v1294_v62, %v1216_v58 }
 0x1e6   :  { %v1376_v4 = vadd.f32 %v3252_v56, %v1363_v0 }
 0x1e7   :  { %v1377_v5 = vadd.f32 %v3252_v56, %v1364_v1 }
 0x1e8   :  { %v1383_v11 = vmax.f32 %v1376_v4, 0.0 }
 0x1e9   :  { %v1384_v14 = vmax.f32 %v1377_v5, 0.0 }
 0x1ea   :  { %v1406_v20 = vmul.f32 %v1392_v2, %v1383_v11  ;;  %v1307_v23 = vpop.f32.mrf.mxu2 }
 0x1eb   :  { %v1407_v22 = vmul.f32 %v1393_v3, %v1384_v14  ;;  %v1320_v26 = vpop.f32.mrf.mxu3  ;;  %v1365_v27 = vadd.f32 %v1307_v23, %v1217_v16  ;;  %v1283_v29 = vpop.f32.mrf.mxu0  ;;  %v1398_v3 = vperm.slane %v3257_v63, 6 }
 0x1ec   :  { %v1366_v28 = vadd.f32 %v1320_v26, %v1218_v17  ;;  %v1296_v30 = vpop.f32.mrf.mxu1 }
 0x1ed   :  { %v1413_v31 = vpack.c.bf16 %v1407_v22, %v1406_v20  ;;  %v1378_v32 = vadd.f32 %v3252_v56, %v1365_v27 }
 0x1ee   :  { %v1379_v21 = vadd.f32 %v3252_v56, %v1366_v28  ;;  %v2676_v28 = vld [vmem:[%s3656_s3 + $0x4] sm:$0xf] }
 0x1ef   :  { %v1424_v34 = vunpack.c.l.b16 %v1413_v31  ;;  %v1425_v35 = vunpack.c.h.b16 %v1413_v31  ;;  %v1385_v36 = vmax.f32 %v1378_v32, 0.0 }
 0x1f0   :  { %v1386_v37 = vmax.f32 %v1379_v21, 0.0 }
 0x1f1   :  { %v3269_v8 = vpack.c.b16 %v1424_v34, %v1424_v34  ;;  %v3271_v12 = vpack.c.b16 %v1425_v35, %v1425_v35  ;;  %v1408_v41 = vmul.f32 %v1394_v33, %v1385_v36 }
 0x1f2   :  { %v1409_v42 = vmul.f32 %v1395_v24, %v1386_v37  ;;  %v1309_v19 = vpop.f32.mrf.mxu2 }
 0x1f3   :  { %v1322_v44 = vpop.f32.mrf.mxu3  ;;  %1440 = vrot.lane.b32.xlu2 %v3271_v12, %s2750_s30  ;;  %1438 = vrot.lane.b32.xlu1 %v3269_v8, %s2750_s30  ;;  %v1333_v25 = vpop.f32.mrf.mxu0 }
 0x1f4   :  { %v1414_v45 = vpack.c.bf16 %v1409_v42, %v1408_v41  ;;  %v1346_v40 = vpop.f32.mrf.mxu1  ;;  %v1367_v7 = vadd.f32 %v1333_v25, %v1219_v15 }
 0x1f5   :  { %v1368_v6 = vadd.f32 %v1346_v40, %v1220_v18 }
 0x1f6   :  { %v1426_v46 = vunpack.c.l.b16 %v1414_v45  ;;  %v1427_v47 = vunpack.c.h.b16 %v1414_v45  ;;  %v1380_v48 = vadd.f32 %v3252_v56, %v1367_v7 }
 0x1f7   :  { %v1381_v50 = vadd.f32 %v3252_v56, %v1368_v6 }
 0x1f8   :  { %v3283_v54 = vpack.c.b16 %v1426_v46, %v1426_v46  ;;  %v3285_v55 = vpack.c.b16 %v1427_v47, %v1427_v47  ;;  %v1387_v57 = vmax.f32 %v1380_v48, 0.0 }
 0x1f9   :  { %v1388_v58 = vmax.f32 %v1381_v50, 0.0 }
 0x1fa   :  { %v1410_v60 = vmul.f32 %v1396_v49, %v1387_v57  ;;  %v1359_v62 = vpop.f32.mrf.mxu2  ;;  %v1417_v57 = vld [vmem:[%s3656_s3] sm:$0xf] }
 0x1fb   :  { %v1411_v61 = vmul.f32 %v1397_v52, %v1388_v58  ;;  %1444 = vrot.lane.b32.xlu2 %v3285_v55, %s2750_s30  ;;  %1442 = vrot.lane.b32.xlu1 %v3283_v54, %s2750_s30  ;;  %v1369_v0 = vadd.f32 %v1359_v62, %v1221_v59  ;;  %v1335_v1 = vpop.f32.mrf.mxu0 }
 0x1fc   :  { %v1348_v13 = vpop.f32.mrf.mxu1 }
 0x1fd   :  { %v1415_v43 = vpack.c.bf16 %v1411_v61, %v1410_v60  ;;  %v1382_v2 = vadd.f32 %v3252_v56, %v1369_v0 }
 0x1ff   :  { %v1428_v4 = vunpack.c.l.b16 %v1415_v43  ;;  %v1429_v5 = vunpack.c.h.b16 %v1415_v43  ;;  %v1389_v51 = vmax.f32 %v1382_v2, 0.0 }
 0x201   :  { %v3294_v9 = vpack.c.b16 %v1428_v4, %v1428_v4  ;;  %v3296_v10 = vpack.c.b16 %v1429_v5, %v1429_v5  ;;  %v1412_v11 = vmul.f32 %v1398_v3, %v1389_v51  ;;  %v2689_v51 = vld [vmem:[%s3656_s3 + $0x8] sm:$0xf] }
 0x202   :  { %v1361_v14 = vpop.f32.mrf.mxu2 }
 0x203   :  { %1446 = vrot.lane.b32.xlu0 %v3294_v9, %s2750_s30  ;;  %1448 = vrot.lane.b32.xlu1 %v3296_v10, %s2750_s30  ;;  %v1416_v16 = vpack.c.bf16 %v1412_v11, %v1412_v11 }
 0x205   :  { %v1430_v17 = vunpack.c.l.b16 %v1416_v16 }
 0x207   :  { %v3302_v56 = vpack.c.b16 %v1430_v17, %v1430_v17 }
 0x209   :  { %1450 = vrot.lane.b32.xlu2 %v3302_v56, %s2750_s30 }
 0x20b   :  { %1559 = vrot.lane.b32.xlu0 %v3271_v12, %s2751_s0  ;;  %1561 = vrot.lane.b32.xlu1 %v3283_v54, %s2751_s0 }
 0x211   :  { %1563 = vrot.lane.b32.xlu2 %v3285_v55, %s2751_s0 }
 0x213   :  { %1557 = vrot.lane.b32.xlu0 %v3269_v8, %s2751_s0  ;;  %1565 = vrot.lane.b32.xlu1 %v3294_v9, %s2751_s0 }
 0x219   :  { %1567 = vrot.lane.b32.xlu2 %v3296_v10, %s2751_s0 }
 0x21b   :  { %1569 = vrot.lane.b32.xlu0 %v3302_v56, %s2751_s0  ;;  %1678 = vrot.lane.b32.xlu1 %v3269_v8, %s2752_s10 }
 0x221   :  { %1680 = vrot.lane.b32.xlu2 %v3271_v12, %s2752_s10 }
 0x223   :  { %1682 = vrot.lane.b32.xlu0 %v3283_v54, %s2752_s10  ;;  %1684 = vrot.lane.b32.xlu1 %v3285_v55, %s2752_s10 }
 0x229   :  { %1686 = vrot.lane.b32.xlu2 %v3294_v9, %s2752_s10 }
 0x22b   :  { %1688 = vrot.lane.b32.xlu0 %v3296_v10, %s2752_s10  ;;  %1690 = vrot.lane.b32.xlu1 %v3302_v56, %s2752_s10 }
 0x231   :  { %1807 = vrot.lane.b32.xlu2 %v3271_v12, %s2753_s11 }
 0x233   :  { %1809 = vrot.lane.b32.xlu0 %v3283_v54, %s2753_s11  ;;  %1811 = vrot.lane.b32.xlu1 %v3285_v55, %s2753_s11 }
 0x239   :  { %1805 = vrot.lane.b32.xlu2 %v3269_v8, %s2753_s11 }
 0x23b   :  { %1813 = vrot.lane.b32.xlu0 %v3294_v9, %s2753_s11  ;;  %1815 = vrot.lane.b32.xlu1 %v3296_v10, %s2753_s11 }
 0x241   :  { %1817 = vrot.lane.b32.xlu2 %v3302_v56, %s2753_s11 }
 0x243   :  { %1932 = vrot.lane.b32.xlu0 %v3269_v8, %s2754_s12  ;;  %1934 = vrot.lane.b32.xlu1 %v3271_v12, %s2754_s12 }
 0x249   :  { %1936 = vrot.lane.b32.xlu2 %v3283_v54, %s2754_s12 }
 0x24b   :  { %1938 = vrot.lane.b32.xlu0 %v3285_v55, %s2754_s12  ;;  %1940 = vrot.lane.b32.xlu1 %v3294_v9, %s2754_s12 }
 0x24d   :  { %v1441_v63 = vpop.permute.xlu2 %1440 }
 0x251   :  { %1942 = vrot.lane.b32.xlu2 %v3296_v10, %s2754_s12 }
 0x253   :  { %1944 = vrot.lane.b32.xlu0 %v3302_v56, %s2754_s12  ;;  %2061 = vrot.lane.b32.xlu1 %v3271_v12, %s2755_s13 }
 0x255   :  { %v1445_v20 = vpop.permute.xlu2 %1444 }
 0x259   :  { %2063 = vrot.lane.b32.xlu2 %v3283_v54, %s2755_s13 }
 0x25b   :  { %2065 = vrot.lane.b32.xlu0 %v3285_v55, %s2755_s13  ;;  %2059 = vrot.lane.b32.xlu1 %v3269_v8, %s2755_s13 }
 0x261   :  { %2067 = vrot.lane.b32.xlu2 %v3294_v9, %s2755_s13 }
 0x263   :  { %2069 = vrot.lane.b32.xlu0 %v3296_v10, %s2755_s13  ;;  %2071 = vrot.lane.b32.xlu1 %v3302_v56, %s2755_s13  ;;  %v1451_v22 = vpop.permute.xlu2 %1450 }
 0x265   :  { %v1439_v23 = vpop.permute.xlu1 %1438 }
 0x266   :  { %v1452_v26 = vsel %vm70_vm0, %v1439_v23, %v1441_v63 }
 0x267   :  { %v1462_v27 = vsel %vm82_vm1, %v1452_v26, 0 }
 0x268   :  { %1486 = vmatpush.bf16.msrb.mxu3 %v1462_v27 }
 0x269   :  { %2186 = vrot.lane.b32.xlu2 %v3269_v8, %s2756_s16 }
 0x26b   :  { %2188 = vrot.lane.b32.xlu0 %v3271_v12, %s2756_s16  ;;  %2190 = vrot.lane.b32.xlu1 %v3283_v54, %s2756_s16  ;;  %v1564_v29 = vpop.permute.xlu2 %1563 }
 0x26c   :  { %2677 = vmatmul.msk.bf16.vlgmr.msrb.gmra.mxu3 %vm78_vm2, %v2676_v28 }
 0x26d   :  { %v1443_v30 = vpop.permute.xlu1 %1442 }
 0x26e   :  { %v1453_v31 = vsel %vm70_vm0, %v1441_v63, %v1443_v30  ;;  %v1454_v32 = vsel %vm70_vm0, %v1443_v30, %v1445_v20 }
 0x26f   :  { %v1465_v33 = vsel %vm82_vm1, %v1453_v31, 0  ;;  %v1468_v21 = vsel %vm82_vm1, %v1454_v32, 0 }
 0x270   :  { %1499 = vmatpush.bf16.msra.mxu0 %v1465_v33  ;;  %1512 = vmatpush.bf16.msra.mxu1 %v1468_v21 }
 0x271   :  { %2192 = vrot.lane.b32.xlu2 %v3285_v55, %s2756_s16 }
 0x273   :  { %2194 = vrot.lane.b32.xlu0 %v3294_v9, %s2756_s16  ;;  %2196 = vrot.lane.b32.xlu1 %v3296_v10, %s2756_s16  ;;  %v1568_v24 = vpop.permute.xlu2 %1567 }
 0x274   :  { %2678 = vmatmul.msk.bf16.vlgmr.msra.gmra.mxu0 %vm78_vm2, %v2676_v28  ;;  %2679 = vmatmul.msk.bf16.vlgmr.msra.gmra.mxu1 %vm78_vm2, %v2676_v28 }
 0x275   :  { %v1447_v34 = vpop.permute.xlu0 %1446  ;;  %v1449_v35 = vpop.permute.xlu1 %1448 }
 0x276   :  { %v1455_v36 = vsel %vm70_vm0, %v1445_v20, %v1447_v34  ;;  %v1456_v37 = vsel %vm70_vm0, %v1447_v34, %v1449_v35  ;;  %v1457_v38 = vsel %vm70_vm0, %v1449_v35, %v1451_v22 }
 0x277   :  { %v1471_v39 = vsel %vm82_vm1, %v1455_v36, 0  ;;  %v1474_v41 = vsel %vm82_vm1, %v1456_v37, 0  ;;  %v1477_v42 = vsel %vm82_vm1, %v1457_v38, 0 }
 0x278   :  { %1525 = vmatpush.bf16.msra.mxu2 %v1471_v39  ;;  %1538 = vmatpush.bf16.msra.mxu3 %v1474_v41 }
 0x279   :  { %1551 = vmatpush.bf16.msrb.mxu0 %v1477_v42  ;;  %2198 = vrot.lane.b32.xlu2 %v3302_v56, %s2756_s16 }
 0x27b   :  { %2680 = vmatmul.msk.bf16.vlgmr.msra.gmra.mxu2 %vm78_vm2, %v2676_v28  ;;  %2315 = vrot.lane.b32.xlu0 %v3271_v12, %s2757_s19  ;;  %v1681_v15 = vpop.permute.xlu2 %1680 }
 0x27c   :  { %2317 = vrot.lane.b32.xlu1 %v3283_v54, %s2757_s19  ;;  %2681 = vmatmul.msk.bf16.vlgmr.msra.gmra.mxu3 %vm78_vm2, %v2676_v28 }
 0x27d   :  { %v1560_v18 = vpop.permute.xlu0 %1559  ;;  %v1562_v19 = vpop.permute.xlu1 %1561 }
 0x27e   :  { %v1572_v44 = vsel %vm211_vm3, %v1560_v18, %v1562_v19  ;;  %v1573_v45 = vsel %vm211_vm3, %v1562_v19, %v1564_v29 }
 0x27f   :  { %v1584_v25 = vsel %vm82_vm1, %v1572_v44, 0  ;;  %v1587_v40 = vsel %vm82_vm1, %v1573_v45, 0 }
 0x280   :  { %1618 = vmatpush.bf16.msrb.mxu2 %v1584_v25  ;;  %1631 = vmatpush.bf16.msrb.mxu3 %v1587_v40 }
 0x281   :  { %2319 = vrot.lane.b32.xlu2 %v3285_v55, %s2757_s19 }
 0x283   :  { %2313 = vrot.lane.b32.xlu0 %v3269_v8, %s2757_s19  ;;  %v1687_v7 = vpop.permute.xlu2 %1686 }
 0x284   :  { %2321 = vrot.lane.b32.xlu1 %v3294_v9, %s2757_s19  ;;  %2682 = vmatmul.msk.bf16.vlgmr.msrb.gmra.mxu0 %vm78_vm2, %v2676_v28 }
 0x285   :  { %v1558_v6 = vpop.permute.xlu0 %1557  ;;  %v1566_v46 = vpop.permute.xlu1 %1565 }
 0x286   :  { %v1571_v47 = vsel %vm211_vm3, %v1558_v6, %v1560_v18  ;;  %v1574_v48 = vsel %vm211_vm3, %v1564_v29, %v1566_v46  ;;  %v1575_v49 = vsel %vm211_vm3, %v1566_v46, %v1568_v24  ;;  %v2696_v18 = vld [vmem:[%s3656_s3 + $0xc] sm:$0xf] }
 0x287   :  { %v1581_v50 = vsel %vm82_vm1, %v1571_v47, 0  ;;  %v1590_v52 = vsel %vm82_vm1, %v1574_v48, 0  ;;  %v1593_v53 = vsel %vm82_vm1, %v1575_v49, 0 }
 0x288   :  { %1605 = vmatpush.bf16.msrb.mxu1 %v1581_v50  ;;  %1644 = vmatpush.bf16.msra.mxu0 %v1590_v52 }
 0x289   :  { %2323 = vrot.lane.b32.xlu2 %v3296_v10, %s2757_s19 }
 0x28b   :  { %2325 = vrot.lane.b32.xlu0 %v3302_v56, %s2757_s19  ;;  %2683 = vmatmul.msk.bf16.vlgmr.msrb.gmra.mxu1 %vm78_vm2, %v1417_v57  ;;  %v1808_v58 = vpop.permute.xlu2 %1807 }
 0x28c   :  { %1657 = vmatpush.bf16.msra.mxu1 %v1593_v53  ;;  %2440 = vrot.lane.b32.xlu1 %v3269_v8, %s2758_s20 }
 0x28d   :  { %2684 = vmatmul.msk.bf16.vlgmr.msrb.gmra.mxu2 %vm78_vm2, %v1417_v57  ;;  %2685 = vmatmul.msk.bf16.vlgmr.msrb.gmra.mxu3 %vm78_vm2, %v1417_v57  ;;  %v1570_v59 = vpop.permute.xlu0 %1569  ;;  %v1679_v60 = vpop.permute.xlu1 %1678 }
 0x28e   :  { %v1576_v61 = vsel %vm211_vm3, %v1568_v24, %v1570_v59  ;;  %v1692_v62 = vsel %vm352_vm4, %v1679_v60, %v1681_v15 }
 0x28f   :  { %v1596_v0 = vsel %vm82_vm1, %v1576_v61, 0  ;;  %v1702_v1 = vsel %vm82_vm1, %v1692_v62, 0 }
 0x290   :  { %1670 = vmatpush.bf16.msra.mxu2 %v1596_v0  ;;  %1726 = vmatpush.bf16.msra.mxu3 %v1702_v1 }
 0x291   :  { %2442 = vrot.lane.b32.xlu2 %v3271_v12, %s2758_s20 }
 0x293   :  { %2444 = vrot.lane.b32.xlu0 %v3283_v54, %s2758_s20  ;;  %v1806_v43 = vpop.permute.xlu2 %1805 }
 0x294   :  { %2446 = vrot.lane.b32.xlu1 %v3285_v55, %s2758_s20  ;;  %2686 = vmatmul.msk.bf16.vlgmr.msra.gmra.mxu0 %vm78_vm2, %v1417_v57  ;;  %v1819_v55 = vsel %vm500_vm5, %v1806_v43, %v1808_v58 }
 0x295   :  { %v1683_v8 = vpop.permute.xlu0 %1682  ;;  %v1685_v13 = vpop.permute.xlu1 %1684  ;;  %v1829_v11 = vsel %vm82_vm1, %v1819_v55, 0 }
 0x296   :  { %v1693_v2 = vsel %vm352_vm4, %v1681_v15, %v1683_v8  ;;  %v1694_v3 = vsel %vm352_vm4, %v1683_v8, %v1685_v13  ;;  %v1695_v4 = vsel %vm352_vm4, %v1685_v13, %v1687_v7 }
 0x297   :  { %v1705_v5 = vsel %vm82_vm1, %v1693_v2, 0  ;;  %v1708_v12 = vsel %vm82_vm1, %v1694_v3, 0  ;;  %v1711_v54 = vsel %vm82_vm1, %v1695_v4, 0 }
 0x298   :  { %1739 = vmatpush.bf16.msrb.mxu0 %v1705_v5  ;;  %1752 = vmatpush.bf16.msrb.mxu1 %v1708_v12 }
 0x299   :  { %1765 = vmatpush.bf16.msrb.mxu2 %v1711_v54  ;;  %2448 = vrot.lane.b32.xlu2 %v3294_v9, %s2758_s20 }
 0x29b   :  { %2450 = vrot.lane.b32.xlu0 %v3296_v10, %s2758_s20  ;;  %2687 = vmatmul.msk.bf16.vlgmr.msra.gmra.mxu1 %vm78_vm2, %v1417_v57  ;;  %v1818_v20 = vpop.permute.xlu2 %1817 }
 0x29c   :  { %2452 = vrot.lane.b32.xlu1 %v3302_v56, %s2758_s20  ;;  %1853 = vmatpush.bf16.msra.mxu1 %v1829_v11 }
 0x29d   :  { %2688 = vmatmul.msk.bf16.vlgmr.msra.gmra.mxu2 %vm78_vm2, %v1417_v57  ;;  %2690 = vmatmul.msk.bf16.vlgmr.msra.gmra.mxu3 %vm78_vm2, %v2689_v51  ;;  %v1689_v9 = vpop.permute.xlu0 %1688  ;;  %v1691_v14 = vpop.permute.xlu1 %1690  ;;  %v2703_v57 = vld [vmem:[%s3656_s3 + $0x10] sm:$0xf] }
 0x29e   :  { %v1696_v16 = vsel %vm352_vm4, %v1687_v7, %v1689_v9  ;;  %v1697_v17 = vsel %vm352_vm4, %v1689_v9, %v1691_v14 }
 0x29f   :  { %v1714_v10 = vsel %vm82_vm1, %v1696_v16, 0  ;;  %v1717_v63 = vsel %vm82_vm1, %v1697_v17, 0 }
 0x2a0   :  { %1778 = vmatpush.bf16.msrb.mxu3 %v1714_v10  ;;  %1791 = vmatpush.bf16.msra.mxu0 %v1717_v63 }
 0x2a3   :  { %v1937_v31 = vpop.permute.xlu2 %1936 }
 0x2a4   :  { %2691 = vmatmul.msk.bf16.vlgmr.msrb.gmra.mxu0 %vm78_vm2, %v2689_v51 }
 0x2a5   :  { %v1810_v56 = vpop.permute.xlu0 %1809  ;;  %v1812_v22 = vpop.permute.xlu1 %1811 }
 0x2a6   :  { %v1820_v23 = vsel %vm500_vm5, %v1808_v58, %v1810_v56  ;;  %v1821_v26 = vsel %vm500_vm5, %v1810_v56, %v1812_v22 }
 0x2a7   :  { %v1832_v27 = vsel %vm82_vm1, %v1820_v23, 0  ;;  %v1835_v28 = vsel %vm82_vm1, %v1821_v26, 0 }
 0x2a8   :  { %1866 = vmatpush.bf16.msra.mxu2 %v1832_v27  ;;  %1879 = vmatpush.bf16.msra.mxu3 %v1835_v28 }
 0x2ab   :  { %2692 = vmatmul.msk.bf16.vlgmr.msrb.gmra.mxu1 %vm78_vm2, %v2689_v51  ;;  %v1943_v15 = vpop.permute.xlu2 %1942 }
 0x2ad   :  { %2693 = vmatmul.msk.bf16.vlgmr.msrb.gmra.mxu2 %vm78_vm2, %v2689_v51  ;;  %2694 = vmatmul.msk.bf16.vlgmr.msrb.gmra.mxu3 %vm78_vm2, %v2689_v51  ;;  %v1814_v29 = vpop.permute.xlu0 %1813  ;;  %v1816_v30 = vpop.permute.xlu1 %1815 }
 0x2ae   :  { %v1822_v32 = vsel %vm500_vm5, %v1812_v22, %v1814_v29  ;;  %v1823_v33 = vsel %vm500_vm5, %v1814_v29, %v1816_v30  ;;  %v1824_v21 = vsel %vm500_vm5, %v1816_v30, %v1818_v20  ;;  %v2710_v22 = vld [vmem:[%s3656_s3 + $0x14] sm:$0xf] }
 0x2af   :  { %v1838_v24 = vsel %vm82_vm1, %v1822_v32, 0  ;;  %v1841_v34 = vsel %vm82_vm1, %v1823_v33, 0  ;;  %v1844_v35 = vsel %vm82_vm1, %v1824_v21, 0 }
 0x2b0   :  { %1892 = vmatpush.bf16.msrb.mxu0 %v1838_v24  ;;  %1905 = vmatpush.bf16.msrb.mxu1 %v1841_v34 }
 0x2b1   :  { %1918 = vmatpush.bf16.msrb.mxu2 %v1844_v35 }
 0x2b3   :  { %v2064_v47 = vpop.permute.xlu2 %2063 }
 0x2b4   :  { %2695 = vmatmul.msk.bf16.vlgmr.msra.gmra.mxu0 %vm78_vm2, %v2689_v51 }
 0x2b5   :  { %v1933_v36 = vpop.permute.xlu0 %1932  ;;  %v1935_v37 = vpop.permute.xlu1 %1934 }
 0x2b6   :  { %v1946_v38 = vsel %vm648_vm6, %v1933_v36, %v1935_v37  ;;  %v1947_v39 = vsel %vm648_vm6, %v1935_v37, %v1937_v31 }
 0x2b7   :  { %v1956_v41 = vsel %vm82_vm1, %v1946_v38, 0  ;;  %v1959_v42 = vsel %vm82_vm1, %v1947_v39, 0 }
 0x2b8   :  { %1980 = vmatpush.bf16.msrb.mxu3 %v1956_v41  ;;  %1993 = vmatpush.bf16.msra.mxu0 %v1959_v42 }
 0x2bb   :  { %2697 = vmatmul.msk.bf16.vlgmr.msra.gmra.mxu1 %vm78_vm2, %v2696_v18  ;;  %v2068_v58 = vpop.permute.xlu2 %2067 }
 0x2bd   :  { %2698 = vmatmul.msk.bf16.vlgmr.msra.gmra.mxu2 %vm78_vm2, %v2696_v18  ;;  %2699 = vmatmul.msk.bf16.vlgmr.msra.gmra.mxu3 %vm78_vm2, %v2696_v18  ;;  %v1939_v19 = vpop.permute.xlu0 %1938  ;;  %v1941_v44 = vpop.permute.xlu1 %1940 }
 0x2be   :  { %v1948_v45 = vsel %vm648_vm6, %v1937_v31, %v1939_v19  ;;  %v1949_v25 = vsel %vm648_vm6, %v1939_v19, %v1941_v44  ;;  %v1950_v40 = vsel %vm648_vm6, %v1941_v44, %v1943_v15  ;;  %v2717_v19 = vld [vmem:[%s3656_s3 + $0x18] sm:$0xf] }
 0x2bf   :  { %v1962_v7 = vsel %vm82_vm1, %v1948_v45, 0  ;;  %v1965_v6 = vsel %vm82_vm1, %v1949_v25, 0  ;;  %v1968_v46 = vsel %vm82_vm1, %v1950_v40, 0 }
 0x2c0   :  { %2006 = vmatpush.bf16.msra.mxu1 %v1962_v7  ;;  %2019 = vmatpush.bf16.msra.mxu2 %v1965_v6 }
 0x2c1   :  { %2032 = vmatpush.bf16.msra.mxu3 %v1968_v46 }
 0x2c3   :  { %v2187_v4 = vpop.permute.xlu2 %2186 }
 0x2c4   :  { %2700 = vmatmul.msk.bf16.vlgmr.msrb.gmra.mxu0 %vm78_vm2, %v2696_v18 }
 0x2c5   :  { %v1945_v48 = vpop.permute.xlu0 %1944  ;;  %v2062_v49 = vpop.permute.xlu1 %2061 }
 0x2c6   :  { %v1951_v50 = vsel %vm648_vm6, %v1943_v15, %v1945_v48  ;;  %v2074_v53 = vsel %vm796_vm7, %v2062_v49, %v2064_v47 }
 0x2c7   :  { %v1971_v52 = vsel %vm82_vm1, %v1951_v50, 0  ;;  %v2086_v59 = vsel %vm82_vm1, %v2074_v53, 0 }
 0x2c8   :  { %2045 = vmatpush.bf16.msrb.mxu0 %v1971_v52 }
 0x2cb   :  { %2701 = vmatmul.msk.bf16.vlgmr.msrb.gmra.mxu1 %vm78_vm2, %v2696_v18  ;;  %v2193_v16 = vpop.permute.xlu2 %2192 }
 0x2cd   :  { %2702 = vmatmul.msk.bf16.vlgmr.msrb.gmra.mxu2 %vm78_vm2, %v2696_v18  ;;  %2704 = vmatmul.msk.bf16.vlgmr.msrb.gmra.mxu3 %vm78_vm2, %v2703_v57  ;;  %v2066_v60 = vpop.permute.xlu0 %2065  ;;  %v2060_v61 = vpop.permute.xlu1 %2059 }
 0x2ce   :  { %2120 = vmatpush.bf16.msrb.mxu2 %v2086_v59  ;;  %v2075_v62 = vsel %vm796_vm7, %v2064_v47, %v2066_v60  ;;  %v2073_v0 = vsel %vm796_vm7, %v2060_v61, %v2062_v49  ;;  %v2076_v13 = vsel %vm796_vm7, %v2066_v60, %v2068_v58 }
 0x2cf   :  { %v2089_v1 = vsel %vm82_vm1, %v2075_v62, 0  ;;  %v2083_v8 = vsel %vm82_vm1, %v2073_v0, 0  ;;  %v2092_v43 = vsel %vm82_vm1, %v2076_v13, 0 }
 0x2d0   :  { %2107 = vmatpush.bf16.msrb.mxu1 %v2083_v8  ;;  %2133 = vmatpush.bf16.msrb.mxu3 %v2089_v1 }
 0x2d3   :  { %v2199_v27 = vpop.permute.xlu2 %2198 }
 0x2d4   :  { %2705 = vmatmul.msk.bf16.vlgmr.msra.gmra.mxu0 %vm78_vm2, %v2703_v57 }
 0x2d5   :  { %2146 = vmatpush.bf16.msra.mxu0 %v2092_v43  ;;  %v2070_v2 = vpop.permute.xlu0 %2069  ;;  %v2072_v3 = vpop.permute.xlu1 %2071 }
 0x2d6   :  { %v2077_v5 = vsel %vm796_vm7, %v2068_v58, %v2070_v2  ;;  %v2078_v12 = vsel %vm796_vm7, %v2070_v2, %v2072_v3 }
 0x2d7   :  { %v2095_v54 = vsel %vm82_vm1, %v2077_v5, 0  ;;  %v2098_v55 = vsel %vm82_vm1, %v2078_v12, 0 }
 0x2db   :  { %2706 = vmatmul.msk.bf16.vlgmr.msra.gmra.mxu1 %vm78_vm2, %v2703_v57  ;;  %v2320_v36 = vpop.permute.xlu2 %2319 }
 0x2dc   :  { %2159 = vmatpush.bf16.msra.mxu1 %v2095_v54 }
 0x2dd   :  { %2707 = vmatmul.msk.bf16.vlgmr.msra.gmra.mxu2 %vm78_vm2, %v2703_v57  ;;  %2708 = vmatmul.msk.bf16.vlgmr.msra.gmra.mxu3 %vm78_vm2, %v2703_v57  ;;  %v2189_v51 = vpop.permute.xlu0 %2188  ;;  %v2191_v11 = vpop.permute.xlu1 %2190 }
 0x2de   :  { %2172 = vmatpush.bf16.msra.mxu2 %v2098_v55  ;;  %v2200_v9 = vsel %vm944_vm8, %v2187_v4, %v2189_v51  ;;  %v2201_v17 = vsel %vm944_vm8, %v2189_v51, %v2191_v11  ;;  %v2202_v56 = vsel %vm944_vm8, %v2191_v11, %v2193_v16 }
 0x2df   :  { %v2210_v14 = vsel %vm82_vm1, %v2200_v9, 0  ;;  %v2213_v10 = vsel %vm82_vm1, %v2201_v17, 0  ;;  %v2216_v28 = vsel %vm82_vm1, %v2202_v56, 0 }
 0x2e0   :  { %2234 = vmatpush.bf16.msra.mxu3 %v2210_v14 }
 0x2e3   :  { %v2324_v6 = vpop.permute.xlu2 %2323 }
 0x2e4   :  { %2709 = vmatmul.msk.bf16.vlgmr.msrb.gmra.mxu0 %vm78_vm2, %v2703_v57 }
 0x2e5   :  { %2247 = vmatpush.bf16.msrb.mxu0 %v2213_v10  ;;  %v2195_v63 = vpop.permute.xlu0 %2194  ;;  %v2197_v20 = vpop.permute.xlu1 %2196 }
 0x2e6   :  { %v2203_v23 = vsel %vm944_vm8, %v2193_v16, %v2195_v63  ;;  %v2204_v26 = vsel %vm944_vm8, %v2195_v63, %v2197_v20  ;;  %v2205_v33 = vsel %vm944_vm8, %v2197_v20, %v2199_v27 }
 0x2e7   :  { %v2219_v29 = vsel %vm82_vm1, %v2203_v23, 0  ;;  %v2222_v30 = vsel %vm82_vm1, %v2204_v26, 0  ;;  %v2225_v35 = vsel %vm82_vm1, %v2205_v33, 0 }
 0x2eb   :  { %2711 = vmatmul.msk.bf16.vlgmr.msrb.gmra.mxu1 %vm78_vm2, %v2710_v22  ;;  %v2443_v60 = vpop.permute.xlu2 %2442 }
 0x2ec   :  { %2260 = vmatpush.bf16.msrb.mxu1 %v2216_v28 }
 0x2ed   :  { %2712 = vmatmul.msk.bf16.vlgmr.msrb.gmra.mxu2 %vm78_vm2, %v2710_v22  ;;  %2713 = vmatmul.msk.bf16.vlgmr.msrb.gmra.mxu3 %vm78_vm2, %v2710_v22  ;;  %v2316_v31 = vpop.permute.xlu0 %2315 }
 0x2ee   :  { %2273 = vmatpush.bf16.msrb.mxu2 %v2219_v29  ;;  %2286 = vmatpush.bf16.msrb.mxu3 %v2222_v30  ;;  %v2318_v34 = vpop.permute.xlu1 %2317 }
 0x2ef   :  { %v1488_v32 = vpop.f32.mrf.mxu3  ;;  %v2328_v41 = vsel %vm1092_vm9, %v2316_v31, %v2318_v34  ;;  %v2329_v18 = vsel %vm1092_vm9, %v2318_v34, %v2320_v36 }
 0x2f0   :  { %v2340_v45 = vsel %vm82_vm1, %v2328_v41, 0  ;;  %v2343_v25 = vsel %vm82_vm1, %v2329_v18, 0 }
 0x2f1   :  { %v1501_v21 = vpop.f32.mrf.mxu0  ;;  %v1514_v24 = vpop.f32.mrf.mxu1 }
 0x2f3   :  { %v2449_v16 = vpop.permute.xlu2 %2448 }
 0x2f4   :  { %2714 = vmatmul.msk.bf16.vlgmr.msra.gmra.mxu0 %vm78_vm2, %v2710_v22 }
 0x2f5   :  { %2299 = vmatpush.bf16.msra.mxu0 %v2225_v35  ;;  %v2314_v37 = vpop.permute.xlu0 %2313 }
 0x2f6   :  { %v2327_v39 = vsel %vm1092_vm9, %v2314_v37, %v2316_v31  ;;  %v2322_v40 = vpop.permute.xlu1 %2321 }
 0x2f7   :  { %v1490_v38 = vpop.f32.mrf.mxu3  ;;  %v2337_v44 = vsel %vm82_vm1, %v2327_v39, 0  ;;  %v2330_v47 = vsel %vm1092_vm9, %v2320_v36, %v2322_v40  ;;  %v2331_v58 = vsel %vm1092_vm9, %v2322_v40, %v2324_v6 }
 0x2f8   :  { %v2346_v50 = vsel %vm82_vm1, %v2330_v47, 0  ;;  %v2349_v8 = vsel %vm82_vm1, %v2331_v58, 0 }
 0x2f9   :  { %v1503_v42 = vpop.f32.mrf.mxu0  ;;  %v1516_v15 = vpop.f32.mrf.mxu1 }
 0x2fb   :  { %2715 = vmatmul.msk.bf16.vlgmr.msra.gmra.mxu1 %vm78_vm2, %v2710_v22 }
 0x2fc   :  { %2361 = vmatpush.bf16.msra.mxu1 %v2337_v44  ;;  %v2731_v44 = vld [vmem:[%s3656_s3 + $0x20] sm:$0xf] }
 0x2fd   :  { %2716 = vmatmul.msk.bf16.vlgmr.msra.gmra.mxu2 %vm78_vm2, %v2710_v22  ;;  %2718 = vmatmul.msk.bf16.vlgmr.msra.gmra.mxu3 %vm78_vm2, %v2717_v19  ;;  %v2326_v49 = vpop.permute.xlu0 %2325  ;;  %v2724_v22 = vld [vmem:[%s3656_s3 + $0x1c] sm:$0xf] }
 0x2fe   :  { %2374 = vmatpush.bf16.msra.mxu2 %v2340_v45  ;;  %2387 = vmatpush.bf16.msra.mxu3 %v2343_v25  ;;  %v1527_v7 = vpop.f32.mrf.mxu2  ;;  %v2441_v53 = vpop.permute.xlu1 %2440  ;;  %v2332_v61 = vsel %vm1092_vm9, %v2324_v6, %v2326_v49 }
 0x2ff   :  { %v1540_v46 = vpop.f32.mrf.mxu3  ;;  %v2454_v1 = vsel %vm1240_vm10, %v2441_v53, %v2443_v60  ;;  %v2352_v13 = vsel %vm82_vm1, %v2332_v61, 0 }
 0x300   :  { %v2464_v43 = vsel %vm82_vm1, %v2454_v1, 0 }
 0x301   :  { %v1553_v48 = vpop.f32.mrf.mxu0 }
 0x304   :  { %2719 = vmatmul.msk.bf16.vlgmr.msrb.gmra.mxu0 %vm78_vm2, %v2717_v19 }
 0x305   :  { %2400 = vmatpush.bf16.msrb.mxu0 %v2346_v50  ;;  %v2445_v2 = vpop.permute.xlu0 %2444 }
 0x306   :  { %v1529_v52 = vpop.f32.mrf.mxu2  ;;  %v2455_v54 = vsel %vm1240_vm10, %v2443_v60, %v2445_v2  ;;  %v2447_v14 = vpop.permute.xlu1 %2446 }
 0x307   :  { %v1542_v57 = vpop.f32.mrf.mxu3  ;;  %v2467_v9 = vsel %vm82_vm1, %v2455_v54, 0  ;;  %v2456_v63 = vsel %vm1240_vm10, %v2445_v2, %v2447_v14  ;;  %v2457_v23 = vsel %vm1240_vm10, %v2447_v14, %v2449_v16 }
 0x308   :  { %v1607_v59 = vpop.f32.mrf.mxu1  ;;  %v2470_v29 = vsel %vm82_vm1, %v2456_v63, 0  ;;  %v2473_v30 = vsel %vm82_vm1, %v2457_v23, 0 }
 0x309   :  { %v1555_v62 = vpop.f32.mrf.mxu0  ;;  %v1608_v0 = vadd.f32 %v1607_v59, %v1488_v32 }
 0x30b   :  { %2720 = vmatmul.msk.bf16.vlgmr.msrb.gmra.mxu1 %vm78_vm2, %v2717_v19 }
 0x30c   :  { %2413 = vmatpush.bf16.msrb.mxu1 %v2349_v8 }
 0x30d   :  { %2721 = vmatmul.msk.bf16.vlgmr.msrb.gmra.mxu2 %vm78_vm2, %v2717_v19  ;;  %2722 = vmatmul.msk.bf16.vlgmr.msrb.gmra.mxu3 %vm78_vm2, %v2717_v19  ;;  %v2451_v17 = vpop.permute.xlu0 %2450 }
 0x30e   :  { %2426 = vmatpush.bf16.msrb.mxu2 %v2352_v13  ;;  %2488 = vmatpush.bf16.msrb.mxu3 %v2464_v43  ;;  %v2458_v28 = vsel %vm1240_vm10, %v2449_v16, %v2451_v17  ;;  %v2453_v32 = vpop.permute.xlu1 %2452 }
 0x30f   :  { %v2476_v31 = vsel %vm82_vm1, %v2458_v28, 0  ;;  %v2459_v35 = vsel %vm1240_vm10, %v2451_v17, %v2453_v32 }
 0x310   :  { %v1620_v3 = vpop.f32.mrf.mxu2  ;;  %v1633_v5 = vpop.f32.mrf.mxu3  ;;  %v2479_v39 = vsel %vm82_vm1, %v2459_v35, 0 }
 0x311   :  { %v1621_v4 = vadd.f32 %v1620_v3, %v1501_v21  ;;  %v1609_v12 = vpop.f32.mrf.mxu1  ;;  %v1634_v55 = vadd.f32 %v1633_v5, %v1514_v24  ;;  %v1646_v51 = vpop.f32.mrf.mxu0 }
 0x312   :  { %v1647_v11 = vadd.f32 %v1646_v51, %v1527_v7 }
 0x314   :  { %2723 = vmatmul.msk.bf16.vlgmr.msra.gmra.mxu0 %vm78_vm2, %v2717_v19 }
 0x315   :  { %2501 = vmatpush.bf16.msra.mxu0 %v2467_v9 }
 0x318   :  { %v1622_v10 = vpop.f32.mrf.mxu2  ;;  %v1635_v20 = vpop.f32.mrf.mxu3 }
 0x319   :  { %v1659_v56 = vpop.f32.mrf.mxu1  ;;  %v1648_v26 = vpop.f32.mrf.mxu0 }
 0x31a   :  { %v1660_v27 = vadd.f32 %v1659_v56, %v1540_v46 }
 0x31b   :  { %2725 = vmatmul.msk.bf16.vlgmr.msra.gmra.mxu1 %vm78_vm2, %v2724_v22 }
 0x31c   :  { %2514 = vmatpush.bf16.msra.mxu1 %v2470_v29 }
 0x31d   :  { %2726 = vmatmul.msk.bf16.vlgmr.msra.gmra.mxu2 %vm78_vm2, %v2724_v22  ;;  %2727 = vmatmul.msk.bf16.vlgmr.msra.gmra.mxu3 %vm78_vm2, %v2724_v22 }
 0x31e   :  { %2527 = vmatpush.bf16.msra.mxu2 %v2473_v30  ;;  %2540 = vmatpush.bf16.msra.mxu3 %v2476_v31 }
 0x320   :  { %v1672_v33 = vpop.f32.mrf.mxu2  ;;  %v1728_v24 = vpop.f32.mrf.mxu3 }
 0x321   :  { %v1673_v21 = vadd.f32 %v1672_v33, %v1553_v48  ;;  %v1661_v34 = vpop.f32.mrf.mxu1  ;;  %v1797_v36 = vadd.f32 %v1728_v24, %v1608_v0  ;;  %v1741_v37 = vpop.f32.mrf.mxu0  ;;  %v2565_v48 = vld [vmem:[%s3657_s5] sm:$0xff] }
 0x322   :  { %v1798_v38 = vadd.f32 %v1741_v37, %v1621_v4  ;;  %2568 = vperm.xlu2 %2749, %v2565_v48  }
 0x324   :  { %2728 = vmatmul.msk.bf16.vlgmr.msrb.gmra.mxu0 %vm78_vm2, %v2724_v22 }
 0x325   :  { %2553 = vmatpush.bf16.msrb.mxu0 %v2479_v39 }
 0x328   :  { %v1674_v41 = vpop.f32.mrf.mxu2  ;;  %v1730_v42 = vpop.f32.mrf.mxu3 }
 0x329   :  { %v1754_v15 = vpop.f32.mrf.mxu1  ;;  %v1743_v18 = vpop.f32.mrf.mxu0 }
 0x32a   :  { %v1799_v19 = vadd.f32 %v1754_v15, %v1634_v55 }
 0x32b   :  { %2729 = vmatmul.msk.bf16.vlgmr.msrb.gmra.mxu1 %vm78_vm2, %v2724_v22 }
 0x32d   :  { %2730 = vmatmul.msk.bf16.vlgmr.msrb.gmra.mxu2 %vm78_vm2, %v2724_v22  ;;  %2732 = vmatmul.msk.bf16.vlgmr.msrb.gmra.mxu3 %vm78_vm2, %v2731_v44 }
 0x330   :  { %v1767_v45 = vpop.f32.mrf.mxu2  ;;  %v1780_v40 = vpop.f32.mrf.mxu3 }
 0x331   :  { %v1800_v25 = vadd.f32 %v1767_v45, %v1647_v11  ;;  %v1756_v7 = vpop.f32.mrf.mxu1  ;;  %v1801_v6 = vadd.f32 %v1780_v40, %v1660_v27  ;;  %v1793_v46 = vpop.f32.mrf.mxu0 }
 0x332   :  { %v1802_v47 = vadd.f32 %v1793_v46, %v1673_v21 }
 0x334   :  { %2733 = vmatmul.msk.bf16.vlgmr.msra.gmra.mxu0 %vm78_vm2, %v2731_v44 }
 0x338   :  { %v1769_v49 = vpop.f32.mrf.mxu2  ;;  %v1782_v50 = vpop.f32.mrf.mxu3 }
 0x339   :  { %v1855_v52 = vpop.f32.mrf.mxu1  ;;  %v1795_v53 = vpop.f32.mrf.mxu0 }
 0x33a   :  { %v1924_v57 = vadd.f32 %v1855_v52, %v1797_v36 }
 0x33b   :  { %2734 = vmatmul.msk.bf16.vlgmr.msra.gmra.mxu1 %vm78_vm2, %v2731_v44 }
 0x33d   :  { %2735 = vmatmul.msk.bf16.vlgmr.msra.gmra.mxu2 %vm78_vm2, %v2731_v44  ;;  %2736 = vmatmul.msk.bf16.vlgmr.msra.gmra.mxu3 %vm78_vm2, %v2731_v44 }
 0x340   :  { %v1868_v58 = vpop.f32.mrf.mxu2  ;;  %v1881_v60 = vpop.f32.mrf.mxu3 }
 0x341   :  { %v1925_v59 = vadd.f32 %v1868_v58, %v1798_v38  ;;  %v1857_v61 = vpop.f32.mrf.mxu1  ;;  %v1926_v62 = vadd.f32 %v1881_v60, %v1799_v19  ;;  %v1894_v0 = vpop.f32.mrf.mxu0 }
 0x342   :  { %v1927_v1 = vadd.f32 %v1894_v0, %v1800_v25 }
 0x344   :  { %2737 = vmatmul.msk.bf16.vlgmr.msrb.gmra.mxu0 %vm78_vm2, %v2731_v44 }
 0x348   :  { %v1870_v8 = vpop.f32.mrf.mxu2  ;;  %v1883_v13 = vpop.f32.mrf.mxu3 }
 0x349   :  { %v1907_v43 = vpop.f32.mrf.mxu1  ;;  %v1896_v2 = vpop.f32.mrf.mxu0 }
 0x34a   :  { %v1928_v3 = vadd.f32 %v1907_v43, %v1801_v6 }
 0x350   :  { %v1920_v4 = vpop.f32.mrf.mxu2  ;;  %v1982_v12 = vpop.f32.mrf.mxu3 }
 0x351   :  { %v1929_v5 = vadd.f32 %v1920_v4, %v1802_v47  ;;  %v1909_v54 = vpop.f32.mrf.mxu1  ;;  %v2051_v55 = vadd.f32 %v1982_v12, %v1924_v57  ;;  %v1995_v51 = vpop.f32.mrf.mxu0 }
 0x352   :  { %v2052_v11 = vadd.f32 %v1995_v51, %v1925_v59 }
 0x358   :  { %v1922_v9 = vpop.f32.mrf.mxu2  ;;  %v1984_v14 = vpop.f32.mrf.mxu3 }
 0x359   :  { %v2008_v16 = vpop.f32.mrf.mxu1  ;;  %v1997_v17 = vpop.f32.mrf.mxu0  ;;  %v2577_v9 = vld [vmem:[%s3658_s1] sm:$0xff] }
 0x35a   :  { %v2053_v10 = vadd.f32 %v2008_v16, %v1926_v62 }
 0x360   :  { %v2021_v63 = vpop.f32.mrf.mxu2  ;;  %v2034_v56 = vpop.f32.mrf.mxu3 }
 0x361   :  { %v2054_v20 = vadd.f32 %v2021_v63, %v1927_v1  ;;  %v2010_v22 = vpop.f32.mrf.mxu1  ;;  %v2055_v23 = vadd.f32 %v2034_v56, %v1928_v3  ;;  %v2047_v26 = vpop.f32.mrf.mxu0 }
 0x362   :  { %v3610_v27 = vadd.f32 %v2047_v26, %v1929_v5 }
 0x368   :  { %v2023_v28 = vpop.f32.mrf.mxu2  ;;  %v2036_v29 = vpop.f32.mrf.mxu3 }
 0x369   :  { %v2109_v30 = vpop.f32.mrf.mxu1  ;;  %v2049_v31 = vpop.f32.mrf.mxu0 }
 0x36a   :  { %v2178_v32 = vadd.f32 %v2109_v30, %v2051_v55 }
 0x370   :  { %v2122_v33 = vpop.f32.mrf.mxu2  ;;  %v2135_v21 = vpop.f32.mrf.mxu3 }
 0x371   :  { %v2111_v24 = vpop.f32.mrf.mxu1  ;;  %v2180_v34 = vadd.f32 %v2135_v21, %v2053_v10  ;;  %v2148_v35 = vpop.f32.mrf.mxu0  ;;  %v2179_v8 = vadd.f32 %v2122_v33, %v2052_v11  ;;  %v2578_v11 = vld [vmem:[%s3658_s1 + $0x8] sm:$0xff] }
 0x372   :  { %v3612_v36 = vadd.f32 %v2148_v35, %v2054_v20 }
 0x378   :  { %v2124_v37 = vpop.f32.mrf.mxu2  ;;  %v2137_v38 = vpop.f32.mrf.mxu3 }
 0x379   :  { %v2161_v39 = vpop.f32.mrf.mxu1  ;;  %v2150_v41 = vpop.f32.mrf.mxu0 }
 0x37a   :  { %v2182_v42 = vadd.f32 %v2161_v39, %v2055_v23 }
 0x37c   :  { %v2569_v4 = vpop.permute.xlu2 %2568 }
 0x380   :  { %v2174_v15 = vpop.f32.mrf.mxu2  ;;  %v2236_v18 = vpop.f32.mrf.mxu3 }
 0x381   :  { %v2163_v19 = vpop.f32.mrf.mxu1  ;;  %v2249_v44 = vpop.f32.mrf.mxu0  ;;  %v2305_v13 = vadd.f32 %v2236_v18, %v2178_v32  ;;  %v2579_v32 = vld [vmem:[%s3658_s1 + $0x10] sm:$0xff]  ;;  %v2183_v21 = vadd.f32 %v2174_v15, %v3610_v27  ;;  %v2580_v27 = vld [vmem:[%s3658_s1 + $0x18] sm:$0xff] }
 0x382   :  { %v2306_v43 = vadd.f32 %v2249_v44, %v2179_v8 }
 0x388   :  { %v2176_v45 = vpop.f32.mrf.mxu2  ;;  %v2238_v25 = vpop.f32.mrf.mxu3 }
 0x389   :  { %v2262_v40 = vpop.f32.mrf.mxu1  ;;  %v2251_v7 = vpop.f32.mrf.mxu0 }
 0x38a   :  { %v2307_v10 = vadd.f32 %v2262_v40, %v2180_v34  ;;  %v2581_v40 = vld [vmem:[%s3658_s1 + $0x20] sm:$0xff] }
 0x390   :  { %v2275_v6 = vpop.f32.mrf.mxu2  ;;  %v2288_v46 = vpop.f32.mrf.mxu3 }
 0x391   :  { %v2264_v47 = vpop.f32.mrf.mxu1  ;;  %v2301_v48 = vpop.f32.mrf.mxu0  ;;  %v2308_v24 = vadd.f32 %v2275_v6, %v3612_v36  ;;  %v2309_v34 = vadd.f32 %v2288_v46, %v2182_v42  ;;  %v2582_v46 = vld [vmem:[%s3658_s1 + $0x28] sm:$0xff] }
 0x392   :  { %v2310_v37 = vadd.f32 %v2301_v48, %v2183_v21 }
 0x398   :  { %v2277_v49 = vpop.f32.mrf.mxu2  ;;  %v2290_v50 = vpop.f32.mrf.mxu3 }
 0x399   :  { %v2363_v52 = vpop.f32.mrf.mxu1  ;;  %v2303_v53 = vpop.f32.mrf.mxu0 }
 0x39a   :  { %v2432_v2 = vadd.f32 %v2363_v52, %v2305_v13 }
 0x3a0   :  { %v2376_v57 = vpop.f32.mrf.mxu2  ;;  %v2389_v58 = vpop.f32.mrf.mxu3 }
 0x3a1   :  { %v2365_v59 = vpop.f32.mrf.mxu1  ;;  %v2402_v60 = vpop.f32.mrf.mxu0  ;;  %v2433_v5 = vadd.f32 %v2376_v57, %v2306_v43  ;;  %v2434_v56 = vadd.f32 %v2389_v58, %v2307_v10 }
 0x3a2   :  { %v2435_v38 = vadd.f32 %v2402_v60, %v2308_v24 }
 0x3a8   :  { %v2378_v61 = vpop.f32.mrf.mxu2  ;;  %v2391_v62 = vpop.f32.mrf.mxu3 }
 0x3a9   :  { %v2415_v0 = vpop.f32.mrf.mxu1  ;;  %v2404_v1 = vpop.f32.mrf.mxu0 }
 0x3aa   :  { %v2436_v39 = vadd.f32 %v2415_v0, %v2309_v34 }
 0x3b0   :  { %v2428_v3 = vpop.f32.mrf.mxu2  ;;  %v2490_v12 = vpop.f32.mrf.mxu3 }
 0x3b1   :  { %v2417_v54 = vpop.f32.mrf.mxu1  ;;  %v2559_v55 = vadd.f32 %v2490_v12, %v2432_v2  ;;  %v2503_v51 = vpop.f32.mrf.mxu0  ;;  %v2437_v19 = vadd.f32 %v2428_v3, %v2310_v37 }
 0x3b2   :  { %v2560_v14 = vadd.f32 %v2503_v51, %v2433_v5 }
 0x3b3   :  { %v2571_v16 = vadd.f32 %v2569_v4, %v2559_v55 }
 0x3b4   :  { %v2572_v17 = vadd.f32 %v2569_v4, %v2560_v14 }
 0x3b5   :  { %v2583_v63 = vadd.f32 %v2577_v9, %v2571_v16 }
 0x3b6   :  { %v2584_v20 = vadd.f32 %v2578_v11, %v2572_v17 }
 0x3b7   :  { %v2589_v22 = vmax.f32 %v2583_v63, 0.0 }
 0x3b8   :  { %v2430_v23 = vpop.f32.mrf.mxu2  ;;  %v2590_v26 = vmax.f32 %v2584_v20, 0.0  ;;  %v2492_v28 = vpop.f32.mrf.mxu3 }
 0x3b9   :  { %v2516_v29 = vpop.f32.mrf.mxu1  ;;  %2595 = vst [vmem:[%s3659_s7] sm:$0xff] %v2589_v22  ;;  %v2505_v30 = vpop.f32.mrf.mxu0 }
 0x3ba   :  { %v2561_v31 = vadd.f32 %v2516_v29, %v2434_v56  ;;  %2596 = vst [vmem:[%s3659_s7 + $0x8] sm:$0xff] %v2590_v26 }
 0x3bc   :  { %v2573_v33 = vadd.f32 %v2569_v4, %v2561_v31 }
 0x3be   :  { %v2585_v35 = vadd.f32 %v2579_v32, %v2573_v33 }
 0x3c0   :  { %v2591_v41 = vmax.f32 %v2585_v35, 0.0  ;;  %v2529_v18 = vpop.f32.mrf.mxu2  ;;  %v2542_v45 = vpop.f32.mrf.mxu3 }
 0x3c1   :  { %v2562_v44 = vadd.f32 %v2529_v18, %v2435_v38  ;;  %v2518_v25 = vpop.f32.mrf.mxu1  ;;  %v2563_v36 = vadd.f32 %v2542_v45, %v2436_v39  ;;  %v2555_v42 = vpop.f32.mrf.mxu0 }
 0x3c2   :  { %2597 = vst [vmem:[%s3659_s7 + $0x10] sm:$0xff] %v2591_v41  ;;  %v2564_v7 = vadd.f32 %v2555_v42, %v2437_v19 }
 0x3c3   :  { %v2574_v15 = vadd.f32 %v2569_v4, %v2562_v44  ;;  %v2575_v6 = vadd.f32 %v2569_v4, %v2563_v36 }
 0x3c4   :  { %v2576_v48 = vadd.f32 %v2569_v4, %v2564_v7 }
 0x3c5   :  { %v2586_v47 = vadd.f32 %v2580_v27, %v2574_v15  ;;  %v2587_v49 = vadd.f32 %v2581_v40, %v2575_v6 }
 0x3c6   :  { %v2588_v52 = vadd.f32 %v2582_v46, %v2576_v48 }
 0x3c7   :  { %v2592_v50 = vmax.f32 %v2586_v47, 0.0  ;;  %v2593_v53 = vmax.f32 %v2587_v49, 0.0 }
 0x3c8   :  { %v2531_v57 = vpop.f32.mrf.mxu2  ;;  %v2594_v58 = vmax.f32 %v2588_v52, 0.0  ;;  %v2544_v59 = vpop.f32.mrf.mxu3 }
 0x3c9   :  { %2598 = vst [vmem:[%s3659_s7 + $0x18] sm:$0xff] %v2592_v50  ;;  %v2557_v60 = vpop.f32.mrf.mxu0 }
 0x3ca   :  { %2599 = vst [vmem:[%s3659_s7 + $0x20] sm:$0xff] %v2593_v53 }
 0x3cb   :  { %2600 = vst [vmem:[%s3659_s7 + $0x28] sm:$0xff] %v2594_v58 }

</bundles_post_ra>
